<compile_context>
chip_gen: v5e
topology: v5e:2x2
jax: 0.10.0
libtpu: 0.0.40
codegen_flags: <defaults>
</compile_context>

<pallas_src>
import jax
import jax.numpy as jnp
from jax.experimental import pallas as pl
from jax.experimental.pallas import tpu as pltpu

_NEG_INF = -1e30


def _zinb_decoder_kernel(z_ref, y_ref,
                         w1z_ref, w1y_ref, b1_ref,
                         w2_ref, b2_ref,
                         w3_ref, b3_ref,
                         wh_ref, bh_ref,
                         scale_ref, drop_ref):
    """relu(relu(relu([z|y]@W1+b1)@W2+b2)@W3+b3) -> fused (softmax scale | dropout)."""
    # fc1 on the (virtually) concatenated [z, y] input: split-K matmul, f32 acc.
    h = (jnp.dot(z_ref[...], w1z_ref[...], preferred_element_type=jnp.float32)
         + jnp.dot(y_ref[...], w1y_ref[...], preferred_element_type=jnp.float32)
         + b1_ref[...])
    h = jnp.maximum(h, 0.0)

    h = jnp.dot(h.astype(w2_ref.dtype), w2_ref[...],
                preferred_element_type=jnp.float32) + b2_ref[...]
    h = jnp.maximum(h, 0.0)

    h = jnp.dot(h.astype(w3_ref.dtype), w3_ref[...],
                preferred_element_type=jnp.float32) + b3_ref[...]
    h = jnp.maximum(h, 0.0)

    # Fused [scale | dropout] head: one lane-dense (tm, 2*Gp) matmul.
    head = jnp.dot(h.astype(wh_ref.dtype), wh_ref[...],
                   preferred_element_type=jnp.float32) + bh_ref[...]
    gp = scale_ref.shape[-1]
    logits = head[:, :gp]          # padded columns hold -1e30 bias -> exp == 0
    drop = head[:, gp:]

    m = jnp.max(logits, axis=-1, keepdims=True)
    e = jnp.exp(logits - m)
    scale_ref[...] = (e / jnp.sum(e, axis=-1, keepdims=True)).astype(scale_ref.dtype)
    drop_ref[...] = drop.astype(drop_ref.dtype)


def _round_up(x, m):
    return ((x + m - 1) // m) * m


def _pad_cols(a, cols, fill=0.0):
    return jnp.pad(a, ((0, 0), (0, cols - a.shape[1])), constant_values=fill)


def _pad_rows(a, rows_to):
    return jnp.pad(a, ((0, rows_to - a.shape[0]), (0, 0)))


def zinb_decoder_forward(z, y, params, *, tm=512):
    """z: (N, z_dim), y: (..., n_class) with prod(...)==N.
    Returns (scale, theta, dropout) matching the PyTorch forward."""
    w1, b1 = params["fc1"]
    w2, b2 = params["fc2"]
    w3, b3 = params["fc3"]
    ws, bs = params["scale"]
    wd, bd = params["dropout"]
    log_theta = params["log_theta"]

    z_dim = z.shape[-1]
    n_class = w1.shape[0] - z_dim
    n_genes = ws.shape[1]

    y2 = y.reshape(-1, n_class)
    rows = z.shape[0]
    assert y2.shape[0] == rows

    # Lane-padded feature dims (multiples of 128).
    h1p = _round_up(w1.shape[1], 128)
    h2p = _round_up(w2.shape[1], 128)
    h3p = _round_up(w3.shape[1], 128)
    gp = _round_up(n_genes, 128)

    bf16 = jnp.bfloat16
    # fc1 split along the (virtual) concat axis; zero-padded output columns.
    w1z = _pad_cols(w1[:z_dim].astype(bf16), h1p)
    w1y = _pad_cols(w1[z_dim:].astype(bf16), h1p)
    b1p = _pad_cols(b1.reshape(1, -1).astype(jnp.float32), h1p)
    w2p = _pad_cols(_pad_rows(w2.astype(bf16), h1p), h2p)
    b2p = _pad_cols(b2.reshape(1, -1).astype(jnp.float32), h2p)
    w3p = _pad_cols(_pad_rows(w3.astype(bf16), h2p), h3p)
    b3p = _pad_cols(b3.reshape(1, -1).astype(jnp.float32), h3p)
    # Fused head weights/bias: [scale | dropout], each lane-padded to gp cols.
    wh = jnp.concatenate(
        [_pad_cols(_pad_rows(ws.astype(bf16), h3p), gp),
         _pad_cols(_pad_rows(wd.astype(bf16), h3p), gp)], axis=1)
    bh = jnp.concatenate(
        [_pad_cols(bs.reshape(1, -1).astype(jnp.float32), gp, fill=_NEG_INF),
         _pad_cols(bd.reshape(1, -1).astype(jnp.float32), gp)], axis=1)

    z_bf = z.astype(bf16)
    y_bf = y2.astype(bf16)

    # Row tile: large to amortize per-step overhead and fill MXU rows, clamped
    # to a multiple of 8 so tiny inputs don't request a block >> the array.
    tm = max(8, min(tm, _round_up(rows, 8)))
    tm = (tm // 8) * 8
    grid = (pl.cdiv(rows, tm),)

    def full_spec(arr):
        # Whole (small, lane-padded) parameter lives in VMEM every grid step.
        return pl.BlockSpec(arr.shape, lambda i: (0,) * arr.ndim)

    scale_p, drop_p = pl.pallas_call(
        _zinb_decoder_kernel,
        out_shape=(
            jax.ShapeDtypeStruct((rows, gp), jnp.float32),
            jax.ShapeDtypeStruct((rows, gp), jnp.float32),
        ),
        grid_spec=pltpu.PrefetchScalarGridSpec(
            num_scalar_prefetch=0,
            grid=grid,
            in_specs=[
                pl.BlockSpec((tm, z_dim), lambda i: (i, 0)),     # z row tile
                pl.BlockSpec((tm, n_class), lambda i: (i, 0)),   # y row tile
                full_spec(w1z), full_spec(w1y), full_spec(b1p),
                full_spec(w2p), full_spec(b2p),
                full_spec(w3p), full_spec(b3p),
                full_spec(wh), full_spec(bh),
            ],
            out_specs=[
                pl.BlockSpec((tm, gp), lambda i: (i, 0)),
                pl.BlockSpec((tm, gp), lambda i: (i, 0)),
            ],
        ),
        compiler_params=pltpu.CompilerParams(
            dimension_semantics=("parallel",)),
    )(z_bf, y_bf, w1z, w1y, b1p, w2p, b2p, w3p, b3p, wh, bh)

    theta = jnp.exp(log_theta)   # parameter-only transform; no kernel needed
    return scale_p[:, :n_genes], theta, drop_p[:, :n_genes]


def make_params(key, z_dim, hidden_dim1, hidden_dim2, hidden_dim3, n_genes, n_class):
    """Weights stored as (in, out) so the kernel computes x @ W + b
    (equivalent to PyTorch's x @ weight.T + bias)."""
    n_input = z_dim + n_class
    dims = [("fc1", n_input, hidden_dim1),
            ("fc2", hidden_dim1, hidden_dim2),
            ("fc3", hidden_dim2, hidden_dim3),
            ("scale", hidden_dim3, n_genes),
            ("dropout", hidden_dim3, n_genes)]
    params = {}
    for name, din, dout in dims:
        key, kw, kb = jax.random.split(key, 3)
        s = 1.0 / jnp.sqrt(jnp.float32(din))
        params[name] = (
            jax.random.uniform(kw, (din, dout), jnp.float32, -s, s),
            jax.random.uniform(kb, (dout,), jnp.float32, -s, s))
    key, kt = jax.random.split(key)
    params["log_theta"] = jax.random.normal(kt, (n_genes,), jnp.float32)
    return params


def reference_forward(z, y, params):
    """Pure-JAX reference mirroring the kernel numerics (bf16 matmul operands,
    f32 accumulation) so tolerances can stay tight."""
    w1, b1 = params["fc1"]
    w2, b2 = params["fc2"]
    w3, b3 = params["fc3"]
    ws, bs = params["scale"]
    wd, bd = params["dropout"]
    n_class = w1.shape[0] - z.shape[-1]
    zy = jnp.concatenate([z, y.reshape(-1, n_class)], axis=1)

    def lin(x, w, b):
        return jnp.dot(x.astype(jnp.bfloat16), w.astype(jnp.bfloat16),
                       preferred_element_type=jnp.float32) + b

    h = jnp.maximum(lin(zy, w1, b1), 0.0)
    h = jnp.maximum(lin(h, w2, b2), 0.0)
    h = jnp.maximum(lin(h, w3, b3), 0.0)
    scale = jax.nn.softmax(lin(h, ws, bs), axis=-1)
    theta = jnp.exp(params["log_theta"])
    dropout = lin(h, wd, bd)
    return scale, theta, dropout


if __name__ == "__main__":
    # Small shapes consistent with the module: z:(N, z_dim), y:(B, S, n_class).
    B, S = 2, 75                       # N = 150 rows (exercises ragged tail)
    z_dim, n_class = 16, 8
    hidden_dim1, hidden_dim2, hidden_dim3 = 64, 48, 32
    n_genes = 100

    key = jax.random.PRNGKey(0)
    kz, ky, kp = jax.random.split(key, 3)
    z = jax.random.normal(kz, (B * S, z_dim), jnp.float32)
    y = jax.random.uniform(ky, (B, S, n_class), jnp.float32)  # soft labels; any float works

    params = make_params(kp, z_dim, hidden_dim1, hidden_dim2, hidden_dim3,
                         n_genes, n_class)

    scale, theta, dropout = zinb_decoder_forward(z, y, params)
    jax.block_until_ready((scale, theta, dropout))

    scale_r, theta_r, dropout_r = reference_forward(z, y, params)

    assert scale.shape == (B * S, n_genes)
    assert dropout.shape == (B * S, n_genes)
    assert theta.shape == (n_genes,)
    assert jnp.allclose(scale, scale_r, atol=2e-3, rtol=2e-3)
    assert jnp.allclose(dropout, dropout_r, atol=2e-3, rtol=2e-3)
    assert jnp.allclose(theta, theta_r, atol=1e-6, rtol=1e-6)
    assert jnp.allclose(jnp.sum(scale, axis=-1), 1.0, atol=1e-3)

    # Also exercise the multi-step grid + partial last block path.
    scale2, _, dropout2 = zinb_decoder_forward(z, y, params, tm=64)
    jax.block_until_ready((scale2, dropout2))
    assert jnp.allclose(scale2, scale_r, atol=2e-3, rtol=2e-3)
    assert jnp.allclose(dropout2, dropout_r, atol=2e-3, rtol=2e-3)

    print("KERNEL_OK")
</pallas_src>

<mosaic_0001>
module attributes {stable_mosaic.version = 11 : i64} {
  func.func @_zinb_decoder_kernel(%arg0: i32, %arg1: memref<152x16xbf16, #tpu.memory_space<vmem>>, %arg2: memref<152x8xbf16, #tpu.memory_space<vmem>>, %arg3: memref<16x128xbf16, #tpu.memory_space<vmem>>, %arg4: memref<8x128xbf16, #tpu.memory_space<vmem>>, %arg5: memref<1x128xf32, #tpu.memory_space<vmem>>, %arg6: memref<128x128xbf16, #tpu.memory_space<vmem>>, %arg7: memref<1x128xf32, #tpu.memory_space<vmem>>, %arg8: memref<128x128xbf16, #tpu.memory_space<vmem>>, %arg9: memref<1x128xf32, #tpu.memory_space<vmem>>, %arg10: memref<128x256xbf16, #tpu.memory_space<vmem>>, %arg11: memref<1x256xf32, #tpu.memory_space<vmem>>, %arg12: memref<152x128xf32, #tpu.memory_space<vmem>>, %arg13: memref<152x128xf32, #tpu.memory_space<vmem>>) attributes {dimension_semantics = [#tpu.dimension_semantics<parallel>], iteration_bounds = array<i64: 1>, scalar_prefetch = 0 : i64, scratch_operands = 0 : i64, tpu.core_type = #tpu.core_type<tc>, window_params = [{transform_indices = @transform_0, window_bounds = array<i64: 152, 16>}, {transform_indices = @transform_1, window_bounds = array<i64: 152, 8>}, {pipeline_mode = #tpu.pipeline_mode<synchronous>, transform_indices = @transform_2, window_bounds = array<i64: 16, 128>}, {pipeline_mode = #tpu.pipeline_mode<synchronous>, transform_indices = @transform_3, window_bounds = array<i64: 8, 128>}, {pipeline_mode = #tpu.pipeline_mode<synchronous>, transform_indices = @transform_4, window_bounds = array<i64: 1, 128>}, {pipeline_mode = #tpu.pipeline_mode<synchronous>, transform_indices = @transform_5, window_bounds = array<i64: 128, 128>}, {pipeline_mode = #tpu.pipeline_mode<synchronous>, transform_indices = @transform_6, window_bounds = array<i64: 1, 128>}, {pipeline_mode = #tpu.pipeline_mode<synchronous>, transform_indices = @transform_7, window_bounds = array<i64: 128, 128>}, {pipeline_mode = #tpu.pipeline_mode<synchronous>, transform_indices = @transform_8, window_bounds = array<i64: 1, 128>}, {pipeline_mode = #tpu.pipeline_mode<synchronous>, transform_indices = @transform_9, window_bounds = array<i64: 128, 256>}, {pipeline_mode = #tpu.pipeline_mode<synchronous>, transform_indices = @transform_10, window_bounds = array<i64: 1, 256>}, {transform_indices = @transform_11, window_bounds = array<i64: 152, 128>}, {transform_indices = @transform_12, window_bounds = array<i64: 152, 128>}]} {
    %c0 = arith.constant 0 : index
    %c0_0 = arith.constant 0 : index
    %0 = vector.load %arg1[%c0, %c0_0] : memref<152x16xbf16, #tpu.memory_space<vmem>>, vector<152x16xbf16>
    %c0_1 = arith.constant 0 : index
    %c0_2 = arith.constant 0 : index
    %1 = vector.load %arg3[%c0_1, %c0_2] : memref<16x128xbf16, #tpu.memory_space<vmem>>, vector<16x128xbf16>
    %cst = arith.constant dense<0.000000e+00> : vector<152x128xf32>
    %2 = tpu.matmul %0, %1, %cst {dimension_numbers = #tpu.dot_dimension_numbers<[1], [0], [0], [1], [0, 0, 1, 1], [], []>} : vector<152x16xbf16>, vector<16x128xbf16>, vector<152x128xf32> -> vector<152x128xf32>
    %c0_3 = arith.constant 0 : index
    %c0_4 = arith.constant 0 : index
    %3 = vector.load %arg2[%c0_3, %c0_4] : memref<152x8xbf16, #tpu.memory_space<vmem>>, vector<152x8xbf16>
    %c0_5 = arith.constant 0 : index
    %c0_6 = arith.constant 0 : index
    %4 = vector.load %arg4[%c0_5, %c0_6] : memref<8x128xbf16, #tpu.memory_space<vmem>>, vector<8x128xbf16>
    %cst_7 = arith.constant dense<0.000000e+00> : vector<152x128xf32>
    %5 = tpu.matmul %3, %4, %cst_7 {dimension_numbers = #tpu.dot_dimension_numbers<[1], [0], [0], [1], [0, 0, 1, 1], [], []>} : vector<152x8xbf16>, vector<8x128xbf16>, vector<152x128xf32> -> vector<152x128xf32>
    %6 = arith.addf %2, %5 : vector<152x128xf32>
    %c0_8 = arith.constant 0 : index
    %c0_9 = arith.constant 0 : index
    %7 = vector.load %arg5[%c0_8, %c0_9] : memref<1x128xf32, #tpu.memory_space<vmem>>, vector<1x128xf32>
    %8 = vector.broadcast %7 : vector<1x128xf32> to vector<152x128xf32>
    %9 = arith.addf %6, %8 : vector<152x128xf32>
    %cst_10 = arith.constant 0.000000e+00 : f32
    %10 = vector.broadcast %cst_10 : f32 to vector<152x128xf32>
    %11 = arith.maximumf %9, %10 : vector<152x128xf32>
    %12 = arith.truncf %11 : vector<152x128xf32> to vector<152x128xbf16>
    %c0_11 = arith.constant 0 : index
    %c0_12 = arith.constant 0 : index
    %13 = vector.load %arg6[%c0_11, %c0_12] : memref<128x128xbf16, #tpu.memory_space<vmem>>, vector<128x128xbf16>
    %cst_13 = arith.constant dense<0.000000e+00> : vector<152x128xf32>
    %14 = tpu.matmul %12, %13, %cst_13 {dimension_numbers = #tpu.dot_dimension_numbers<[1], [0], [0], [1], [0, 0, 1, 1], [], []>} : vector<152x128xbf16>, vector<128x128xbf16>, vector<152x128xf32> -> vector<152x128xf32>
    %c0_14 = arith.constant 0 : index
    %c0_15 = arith.constant 0 : index
    %15 = vector.load %arg7[%c0_14, %c0_15] : memref<1x128xf32, #tpu.memory_space<vmem>>, vector<1x128xf32>
    %16 = vector.broadcast %15 : vector<1x128xf32> to vector<152x128xf32>
    %17 = arith.addf %14, %16 : vector<152x128xf32>
    %cst_16 = arith.constant 0.000000e+00 : f32
    %18 = vector.broadcast %cst_16 : f32 to vector<152x128xf32>
    %19 = arith.maximumf %17, %18 : vector<152x128xf32>
    %20 = arith.truncf %19 : vector<152x128xf32> to vector<152x128xbf16>
    %c0_17 = arith.constant 0 : index
    %c0_18 = arith.constant 0 : index
    %21 = vector.load %arg8[%c0_17, %c0_18] : memref<128x128xbf16, #tpu.memory_space<vmem>>, vector<128x128xbf16>
    %cst_19 = arith.constant dense<0.000000e+00> : vector<152x128xf32>
    %22 = tpu.matmul %20, %21, %cst_19 {dimension_numbers = #tpu.dot_dimension_numbers<[1], [0], [0], [1], [0, 0, 1, 1], [], []>} : vector<152x128xbf16>, vector<128x128xbf16>, vector<152x128xf32> -> vector<152x128xf32>
    %c0_20 = arith.constant 0 : index
    %c0_21 = arith.constant 0 : index
    %23 = vector.load %arg9[%c0_20, %c0_21] : memref<1x128xf32, #tpu.memory_space<vmem>>, vector<1x128xf32>
    %24 = vector.broadcast %23 : vector<1x128xf32> to vector<152x128xf32>
    %25 = arith.addf %22, %24 : vector<152x128xf32>
    %cst_22 = arith.constant 0.000000e+00 : f32
    %26 = vector.broadcast %cst_22 : f32 to vector<152x128xf32>
    %27 = arith.maximumf %25, %26 : vector<152x128xf32>
    %28 = arith.truncf %27 : vector<152x128xf32> to vector<152x128xbf16>
    %c0_23 = arith.constant 0 : index
    %c0_24 = arith.constant 0 : index
    %29 = vector.load %arg10[%c0_23, %c0_24] : memref<128x256xbf16, #tpu.memory_space<vmem>>, vector<128x256xbf16>
    %cst_25 = arith.constant dense<0.000000e+00> : vector<152x256xf32>
    %30 = tpu.matmul %28, %29, %cst_25 {dimension_numbers = #tpu.dot_dimension_numbers<[1], [0], [0], [1], [0, 0, 1, 1], [], []>} : vector<152x128xbf16>, vector<128x256xbf16>, vector<152x256xf32> -> vector<152x256xf32>
    %c0_26 = arith.constant 0 : index
    %c0_27 = arith.constant 0 : index
    %31 = vector.load %arg11[%c0_26, %c0_27] : memref<1x256xf32, #tpu.memory_space<vmem>>, vector<1x256xf32>
    %32 = vector.broadcast %31 : vector<1x256xf32> to vector<152x256xf32>
    %33 = arith.addf %30, %32 : vector<152x256xf32>
    %34 = vector.extract_strided_slice %33 {offsets = [0, 0], sizes = [152, 128], strides = [1, 1]} : vector<152x256xf32> to vector<152x128xf32>
    %35 = vector.extract_strided_slice %33 {offsets = [0, 128], sizes = [152, 128], strides = [1, 1]} : vector<152x256xf32> to vector<152x128xf32>
    %cst_28 = arith.constant dense<0xFF800000> : vector<152xf32>
    %36 = vector.multi_reduction <maximumf>, %34, %cst_28 [1] : vector<152x128xf32> to vector<152xf32>
    %37 = vector.shape_cast %36 : vector<152xf32> to vector<152x1xf32>
    %38 = vector.broadcast %37 : vector<152x1xf32> to vector<152x128xf32>
    %39 = arith.subf %34, %38 : vector<152x128xf32>
    %40 = math.exp %39 : vector<152x128xf32>
    %cst_29 = arith.constant dense<0.000000e+00> : vector<152xf32>
    %41 = vector.multi_reduction <add>, %40, %cst_29 [1] : vector<152x128xf32> to vector<152xf32>
    %42 = vector.shape_cast %41 : vector<152xf32> to vector<152x1xf32>
    %43 = vector.broadcast %42 : vector<152x1xf32> to vector<152x128xf32>
    %44 = arith.divf %40, %43 : vector<152x128xf32>
    %c0_30 = arith.constant 0 : index
    %c0_31 = arith.constant 0 : index
    %45 = vector.load %arg12[%c0_30, %c0_31] : memref<152x128xf32, #tpu.memory_space<vmem>>, vector<152x128xf32>
    tpu.vector_store %arg12[%c0_30, %c0_31], %44 {strides = array<i32>} : memref<152x128xf32, #tpu.memory_space<vmem>>, vector<152x128xf32>,
    %c0_32 = arith.constant 0 : index
    %c0_33 = arith.constant 0 : index
    %46 = vector.load %arg13[%c0_32, %c0_33] : memref<152x128xf32, #tpu.memory_space<vmem>>, vector<152x128xf32>
    tpu.vector_store %arg13[%c0_32, %c0_33], %35 {strides = array<i32>} : memref<152x128xf32, #tpu.memory_space<vmem>>, vector<152x128xf32>,
    return
  }
  func.func @transform_0(%arg0: i32) -> (i32, i32) {
    %c0_i32 = arith.constant 0 : i32
    %c0_i32_0 = arith.constant 0 : i32
    return %arg0, %c0_i32 : i32, i32
  }
  func.func @transform_1(%arg0: i32) -> (i32, i32) {
    %c0_i32 = arith.constant 0 : i32
    %c0_i32_0 = arith.constant 0 : i32
    return %arg0, %c0_i32 : i32, i32
  }
  func.func @transform_2(%arg0: i32) -> (i32, i32) {
    %c0_i32 = arith.constant 0 : i32
    %c0_i32_0 = arith.constant 0 : i32
    %c0_i32_1 = arith.constant 0 : i32
    return %c0_i32, %c0_i32_0 : i32, i32
  }
  func.func @transform_3(%arg0: i32) -> (i32, i32) {
    %c0_i32 = arith.constant 0 : i32
    %c0_i32_0 = arith.constant 0 : i32
    %c0_i32_1 = arith.constant 0 : i32
    return %c0_i32, %c0_i32_0 : i32, i32
  }
  func.func @transform_4(%arg0: i32) -> (i32, i32) {
    %c0_i32 = arith.constant 0 : i32
    %c0_i32_0 = arith.constant 0 : i32
    %c0_i32_1 = arith.constant 0 : i32
    return %c0_i32, %c0_i32_0 : i32, i32
  }
  func.func @transform_5(%arg0: i32) -> (i32, i32) {
    %c0_i32 = arith.constant 0 : i32
    %c0_i32_0 = arith.constant 0 : i32
    %c0_i32_1 = arith.constant 0 : i32
    return %c0_i32, %c0_i32_0 : i32, i32
  }
  func.func @transform_6(%arg0: i32) -> (i32, i32) {
    %c0_i32 = arith.constant 0 : i32
    %c0_i32_0 = arith.constant 0 : i32
    %c0_i32_1 = arith.constant 0 : i32
    return %c0_i32, %c0_i32_0 : i32, i32
  }
  func.func @transform_7(%arg0: i32) -> (i32, i32) {
    %c0_i32 = arith.constant 0 : i32
    %c0_i32_0 = arith.constant 0 : i32
    %c0_i32_1 = arith.constant 0 : i32
    return %c0_i32, %c0_i32_0 : i32, i32
  }
  func.func @transform_8(%arg0: i32) -> (i32, i32) {
    %c0_i32 = arith.constant 0 : i32
    %c0_i32_0 = arith.constant 0 : i32
    %c0_i32_1 = arith.constant 0 : i32
    return %c0_i32, %c0_i32_0 : i32, i32
  }
  func.func @transform_9(%arg0: i32) -> (i32, i32) {
    %c0_i32 = arith.constant 0 : i32
    %c0_i32_0 = arith.constant 0 : i32
    %c0_i32_1 = arith.constant 0 : i32
    return %c0_i32, %c0_i32_0 : i32, i32
  }
  func.func @transform_10(%arg0: i32) -> (i32, i32) {
    %c0_i32 = arith.constant 0 : i32
    %c0_i32_0 = arith.constant 0 : i32
    %c0_i32_1 = arith.constant 0 : i32
    return %c0_i32, %c0_i32_0 : i32, i32
  }
  func.func @transform_11(%arg0: i32) -> (i32, i32) {
    %c0_i32 = arith.constant 0 : i32
    %c0_i32_0 = arith.constant 0 : i32
    return %arg0, %c0_i32 : i32, i32
  }
  func.func @transform_12(%arg0: i32) -> (i32, i32) {
    %c0_i32 = arith.constant 0 : i32
    %c0_i32_0 = arith.constant 0 : i32
    return %arg0, %c0_i32 : i32, i32
  }
}

</mosaic_0001>

<bundles_post_ra>
// kernel: tpu_custom_call.1
= control target key start
LH: loop header
LB: loop body
LE: loop exit
PB: predicated region body
PF: predicated region fallthrough
CT: control target
= control target key end

     0   :  { %18 = vsyncpa [#allocation3], 0  ;;  %s2496_s0 = inlined_call_operand.vmem [shape: bf16[150,16], index: 0, kind: input, shape index: {}]   ;;  %s2497_s1 = inlined_call_operand.vmem [shape: bf16[150,8], index: 1, kind: input, shape index: {}]   ;;  %s2498_s2 = inlined_call_operand.vmem [shape: bf16[16,128], index: 2, kind: input, shape index: {}]   ;;  %s2499_s3 = inlined_call_operand.vmem [shape: bf16[8,128], index: 3, kind: input, shape index: {}]   ;;  %s2500_s4 = inlined_call_operand.vmem [shape: f32[1,128], index: 4, kind: input, shape index: {}]   ;;  %s2501_s5 = inlined_call_operand.hbm [shape: bf16[128,128], index: 5, kind: input, shape index: {}]   ;;  %s2502_s6 = inlined_call_operand.vmem [shape: f32[1,128], index: 6, kind: input, shape index: {}]   ;;  %s2503_s7 = inlined_call_operand.hbm [shape: bf16[128,128], index: 7, kind: input, shape index: {}]   ;;  %s2504_s8 = inlined_call_operand.vmem [shape: f32[1,128], index: 8, kind: input, shape index: {}]   ;;  %s2505_s9 = inlined_call_operand.vmem [shape: bf16[128,256], index: 9, kind: input, shape index: {}]   ;;  %s2506_s10 = inlined_call_operand.vmem [shape: f32[1,256], index: 10, kind: input, shape index: {}]   ;;  %s2507_s11 = inlined_call_operand.hbm [shape: f32[150,128], index: 11, kind: output, shape index: {0}]   ;;  %s2508_s12 = inlined_call_operand.hbm [shape: f32[150,128], index: 12, kind: output, shape index: {1}]  }
   0x1   :  { %19 = vsyncpa [#allocation6], 0 }
   0x2   :  { %20 = vsyncpa [#allocation4], 0 }
   0x3   :  { %21 = vsyncpa [#allocation9], 0  ;;  %s36_s23 = sshll.u32 %s2501_s5, 4  ;;  %s1950_s24 = smov [#allocation2]   ;;  %s37_s23 = int_to_ptr.hbm [resolvable:$true] %s36_s23 }
   0x4   :  { %s38_s25 = sshll.u32 %s1950_s24, 4  ;;  %s51_s28 = sshll.u32 %s2503_s7, 4  ;;  %s39_s25 = int_to_ptr.vmem [resolvable:$true] %s38_s25  ;;  %s52_s28 = int_to_ptr.hbm [resolvable:$true] %s51_s28 }
   0x5   :  { %s1951_s29 = smov 64   ;;  %s1952_s30 = smov 4  }
   0x6   :  { %44 = dma.hbm_to_vmem [thread:$0]  %s37_s23, 1024, %s39_s25, [#allocation3], %s1951_s29, %s1951_s29, %s1952_s30  }
   0x7   :  { %s1953_s13 = smov [#allocation5]  }
   0x8   :  { %s53_s14 = sshll.u32 %s1953_s13, 4  ;;  %s54_s14 = int_to_ptr.vmem [resolvable:$true] %s53_s14 }
   0x9   :  { %59 = dma.hbm_to_vmem [thread:$0]  %s52_s28, 1024, %s54_s14, [#allocation6], %s1951_s29, %s1951_s29, %s1952_s30  }
   0xa   :  { %1942 = dma.done.wait [#allocation3], 1024  }
   0xb   :  { %1943 = vsyncadd [#allocation3], 4294966272 }
   0xc   :  { %1944 = dma.done.wait [#allocation6], 1024  }
   0xd   :  { %1945 = vsyncadd [#allocation6], 4294966272  ;;  %vm195_vm0 = vcmask 1043456   ;;  %v115_v0 = vld [vmem:[%s2499_s3] sm:$0xf]  ;;  %vm164_vm1 = vcmask 64512  }
   0xe   :  { %v1707_v1 = vld [vmem:[%s2498_s2] sm:$0xff]  ;;  %v197_v2 = vsel %vm195_vm0, %v115_v0, 0  ;;  %vm311_vm2 = vcmask 130048   ;;  %v1709_v5 = vld [vmem:[%s2497_s1 + $0x8] sm:$0xff]  ;;  %v1710_v8 = vld [vmem:[%s2497_s1 + $0x10] sm:$0xff]  ;;  %s1455_s28 = sshll.u32 %s2508_s12, 4  ;;  %s1456_s28 = int_to_ptr.hbm [resolvable:$true] %s1455_s28 }
   0xf   :  { %v1708_v3 = vld [vmem:[%s2497_s1] sm:$0xff]  ;;  %206 = vmatpush.bf16.msra.mxu0 %v197_v2  ;;  %349 = vmatpush.bf16.msra.mxu1 %v1707_v1  ;;  %v1699_v6 = vld [vmem:[%s2496_s0 + $0x8] sm:$0xff]  ;;  %v1700_v9 = vld [vmem:[%s2496_s0 + $0x10] sm:$0xff]  ;;  %s1955_s29 = smov 128   ;;  %s1956_s30 = smov 8  }
  0x10   :  { %v1698_v4 = vld [vmem:[%s2496_s0] sm:$0xff]  ;;  %1750 = vmatpush.bf16.msra.mxu3 %v1707_v1  ;;  %1749 = vmatpush.bf16.msra.mxu2 %v197_v2  ;;  %v1703_v7 = vld [vmem:[%s2496_s0 + $0x28] sm:$0xff]  ;;  %v1714_v10 = vld [vmem:[%s2497_s1 + $0x30] sm:$0xff]  ;;  %s1957_s12 = smov [#allocation7]   ;;  %s1442_s5 = sshll.u32 %s2507_s11, 4  ;;  %s1443_s5 = int_to_ptr.hbm [resolvable:$true] %s1442_s5 }
  0x11   :  { %v1704_v11 = vld [vmem:[%s2496_s0 + $0x30] sm:$0xff]  ;;  %v1724_v12 = vld [vmem:[#allocation2 + $0x38] sm:$0xff]  ;;  %v1722_v18 = vld [vmem:[#allocation2 + $0x28] sm:$0xff]  ;;  %s1440_s13 = sshll.u32 %s1957_s12, 4  ;;  %s1441_s13 = int_to_ptr.vmem [resolvable:$true] %s1440_s13 }
  0x12   :  { %1510 = vmatmul.msk.bf16.vlgmr.msra.gmra.mxu0 %vm164_vm1, %v1708_v3  ;;  %1560 = vmatmul.msk.bf16.vlgmr.msra.gmra.mxu1 %vm311_vm2, %v1698_v4  ;;  %v1711_v13 = vld [vmem:[%s2497_s1 + $0x18] sm:$0xff]  ;;  %v1723_v17 = vld [vmem:[#allocation2 + $0x30] sm:$0xff]  ;;  %v1721_v19 = vld [vmem:[#allocation2 + $0x20] sm:$0xff] }
  0x13   :  { %1565 = vmatmul.msk.bf16.vlgmr.msra.gmra.mxu3 %vm311_vm2, %v1703_v7  ;;  %1516 = vmatmul.msk.bf16.vlgmr.msra.gmra.mxu2 %vm164_vm1, %v1714_v10  ;;  %v1701_v14 = vld [vmem:[%s2496_s0 + $0x18] sm:$0xff]  ;;  %v1712_v21 = vld [vmem:[%s2497_s1 + $0x20] sm:$0xff]  ;;  %v1719_v25 = vld [vmem:[#allocation2 + $0x10] sm:$0xff] }
  0x14   :  { %520 = vmatpush.bf16.msrb.mxu2 %v1724_v12  ;;  %v1715_v15 = vld [vmem:[%s2497_s1 + $0x38] sm:$0xff]  ;;  %v1702_v22 = vld [vmem:[%s2496_s0 + $0x20] sm:$0xff]  ;;  %v114_v26 = vld [vmem:[%s2497_s1 + $0x48] sm:$0xf] }
  0x15   :  { %v1705_v16 = vld [vmem:[%s2496_s0 + $0x38] sm:$0xff]  ;;  %v1716_v23 = vld [vmem:[%s2497_s1 + $0x40] sm:$0xff]  ;;  %v153_v27 = vunpack.c.l.b16 %v114_v26  ;;  %v1713_v28 = vld [vmem:[%s2497_s1 + $0x28] sm:$0xff] }
  0x16   :  { %v1720_v20 = vld [vmem:[#allocation2 + $0x18] sm:$0xff]  ;;  %v1706_v24 = vld [vmem:[%s2496_s0 + $0x40] sm:$0xff]  ;;  %v93_v30 = vld [vmem:[%s2496_s0 + $0x48] sm:$0xf] }
  0x17   :  { %v163_v29 = vpack.c.b16 %v153_v27, %v153_v27  ;;  %v294_v31 = vunpack.c.l.b16 %v93_v30  ;;  %v1718_v33 = vld [vmem:[#allocation2 + $0x8] sm:$0xff]  ;;  %v1717_v34 = vld [vmem:[#allocation2] sm:$0xff] }
  0x18   :  { %521 = vmatpush.bf16.msrb.mxu2 %v1723_v17  ;;  %v2118_v38 = vld [vmem:[%s2500_s4] ss:$0 sm:$0xff] }
  0x19   :  { %v304_v32 = vpack.c.b16 %v294_v31, %v294_v31 }
  0x1c   :  { %522 = vmatpush.bf16.msrb.mxu2 %v1722_v18 }
  0x20   :  { %523 = vmatpush.bf16.msrb.mxu2 %v1721_v19 }
  0x22   :  { %1511 = vmatmul.msk.bf16.gmra.mxu0 %vm164_vm1, %v1709_v5  ;;  %1561 = vmatmul.msk.bf16.gmra.mxu1 %vm311_vm2, %v1699_v6 }
  0x23   :  { %1566 = vmatmul.msk.bf16.gmra.mxu3 %vm311_vm2, %v1704_v11  ;;  %1517 = vmatmul.msk.bf16.gmra.mxu2 %vm164_vm1, %v1715_v15 }
  0x24   :  { %524 = vmatpush.bf16.msrb.mxu2 %v1720_v20 }
  0x28   :  { %525 = vmatpush.bf16.msrb.mxu2 %v1719_v25 }
  0x2c   :  { %526 = vmatpush.bf16.msrb.mxu2 %v1718_v33 }
  0x30   :  { %527 = vmatpush.bf16.msrb.mxu2 %v1717_v34 }
  0x32   :  { %1512 = vmatmul.msk.bf16.gmra.mxu0 %vm164_vm1, %v1710_v8  ;;  %1562 = vmatmul.msk.bf16.gmra.mxu1 %vm311_vm2, %v1700_v9 }
  0x33   :  { %1567 = vmatmul.msk.bf16.gmra.mxu3 %vm311_vm2, %v1705_v16  ;;  %1518 = vmatmul.msk.bf16.gmra.mxu2 %vm164_vm1, %v1716_v23 }
  0x42   :  { %1513 = vmatmul.msk.bf16.gmra.mxu0 %vm164_vm1, %v1711_v13  ;;  %1563 = vmatmul.msk.bf16.gmra.mxu1 %vm311_vm2, %v1701_v14  ;;  %v1732_v14 = vld [vmem:[#allocation5 + $0x38] sm:$0xff] }
  0x43   :  { %1568 = vmatmul.msk.bf16.gmra.mxu3 %vm311_vm2, %v1706_v24  ;;  %1519 = vmatmul.msk.bf16.gmra.mxu2 %vm164_vm1, %v163_v29  ;;  %v1731_v24 = vld [vmem:[#allocation5 + $0x30] sm:$0xff] }
  0x44   :  { %675 = vmatpush.bf16.msrb.mxu3 %v1732_v14 }
  0x48   :  { %676 = vmatpush.bf16.msrb.mxu3 %v1731_v24 }
  0x52   :  { %1514 = vmatmul.msk.bf16.gmra.mxu0 %vm164_vm1, %v1712_v21  ;;  %1564 = vmatmul.msk.bf16.gmra.mxu1 %vm311_vm2, %v1702_v22 }
  0x53   :  { %1569 = vmatmul.msk.bf16.gmra.mxu3 %vm311_vm2, %v304_v32 }
  0x62   :  { %1515 = vmatmul.msk.bf16.gmra.mxu0 %vm164_vm1, %v1713_v28  ;;  %v1730_v28 = vld [vmem:[#allocation5 + $0x28] sm:$0xff] }
  0x63   :  { %677 = vmatpush.bf16.msrb.mxu3 %v1730_v28 }
  0x8f   :  { %v208_v35 = vpop.f32.mrf.mxu0  ;;  %v351_v36 = vpop.f32.mrf.mxu1 }
  0x90   :  { %v352_v37 = vadd.f32 %v351_v36, %v208_v35 }
  0x92   :  { %v404_v41 = vadd.f32 %v2118_v38, %v352_v37 }
  0x94   :  { %v423_v44 = vmax.f32 %v404_v41, 0.0 }
  0x96   :  { %v2124_v55 = vpop.f32.mrf.mxu3  ;;  %v238_v4 = vpop.f32.mrf.mxu2 }
  0x97   :  { %v210_v39 = vpop.f32.mrf.mxu0  ;;  %v353_v40 = vpop.f32.mrf.mxu1 }
  0x98   :  { %v354_v42 = vadd.f32 %v353_v40, %v210_v39 }
  0x9a   :  { %v405_v43 = vadd.f32 %v2118_v38, %v354_v42 }
  0x9c   :  { %v424_v45 = vmax.f32 %v405_v43, 0.0  ;;  %v1729_v43 = vld [vmem:[#allocation5 + $0x20] sm:$0xff] }
  0x9d   :  { %678 = vmatpush.bf16.msrb.mxu3 %v1729_v43 }
  0x9e   :  { %v442_v46 = vpack.c.bf16 %v424_v45, %v423_v44  ;;  %v378_v61 = vpop.f32.mrf.mxu3  ;;  %v240_v11 = vpop.f32.mrf.mxu2  ;;  %v1728_v45 = vld [vmem:[#allocation5 + $0x18] sm:$0xff] }
  0x9f   :  { %v213_v47 = vpop.f32.mrf.mxu0  ;;  %v356_v48 = vpop.f32.mrf.mxu1 }
  0xa0   :  { %528 = vmatmul.bf16.vlgmr.msrb.gmra.mxu2 %v442_v46  ;;  %v357_v49 = vadd.f32 %v356_v48, %v213_v47 }
  0xa1   :  { %679 = vmatpush.bf16.msrb.mxu3 %v1728_v45 }
  0xa2   :  { %v406_v52 = vadd.f32 %v2118_v38, %v357_v49 }
  0xa4   :  { %v425_v56 = vmax.f32 %v406_v52, 0.0 }
  0xa6   :  { %v381_v5 = vpop.f32.mrf.mxu3  ;;  %v243_v20 = vpop.f32.mrf.mxu2 }
  0xa7   :  { %v215_v50 = vpop.f32.mrf.mxu0  ;;  %v358_v51 = vpop.f32.mrf.mxu1 }
  0xa8   :  { %v359_v53 = vadd.f32 %v358_v51, %v215_v50 }
  0xaa   :  { %v407_v54 = vadd.f32 %v2118_v38, %v359_v53 }
  0xac   :  { %v426_v57 = vmax.f32 %v407_v54, 0.0 }
  0xae   :  { %v443_v58 = vpack.c.bf16 %v426_v57, %v425_v56  ;;  %v383_v12 = vpop.f32.mrf.mxu3  ;;  %v245_v29 = vpop.f32.mrf.mxu2 }
  0xaf   :  { %v218_v59 = vpop.f32.mrf.mxu0  ;;  %v361_v60 = vpop.f32.mrf.mxu1 }
  0xb0   :  { %533 = vmatmul.bf16.gmra.mxu2 %v443_v58  ;;  %v362_v62 = vadd.f32 %v361_v60, %v218_v59  ;;  %v1727_v58 = vld [vmem:[#allocation5 + $0x10] sm:$0xff]  ;;  %v382_v59 = vadd.f32 %v381_v5, %v238_v4  ;;  %v384_v60 = vadd.f32 %v383_v12, %v240_v11  ;;  %v1725_v5 = vld [vmem:[#allocation5] sm:$0xff] }
  0xb1   :  { %680 = vmatpush.bf16.msrb.mxu3 %v1727_v58 }
  0xb2   :  { %v408_v1 = vadd.f32 %v2118_v38, %v362_v62  ;;  %v1726_v62 = vld [vmem:[#allocation5 + $0x8] sm:$0xff] }
  0xb4   :  { %v427_v6 = vmax.f32 %v408_v1, 0.0  ;;  %v417_v1 = vadd.f32 %v2118_v38, %v384_v60  ;;  %v1676_v60 = vld [vmem:[%s2505_s9 + $0x50] sm:$0xf] }
  0xb5   :  { %681 = vmatpush.bf16.msrb.mxu3 %v1726_v62  ;;  %v1744_v62 = vld [vmem:[%s2505_s9 + $0x54] sm:$0xf0] }
  0xb6   :  { %v386_v23 = vpop.f32.mrf.mxu3  ;;  %v248_v37 = vpop.f32.mrf.mxu2 }
  0xb7   :  { %v220_v63 = vpop.f32.mrf.mxu0  ;;  %v363_v0 = vpop.f32.mrf.mxu1 }
  0xb8   :  { %v364_v2 = vadd.f32 %v363_v0, %v220_v63  ;;  %v416_v0 = vadd.f32 %v2118_v38, %v382_v59 }
  0xb9   :  { %682 = vmatpush.bf16.msrb.mxu3 %v1725_v5  ;;  %v1660_v5 = vld [vmem:[%s2505_s9 + $0x30] sm:$0xf] }
  0xba   :  { %v409_v3 = vadd.f32 %v2118_v38, %v364_v2  ;;  %v436_v2 = vmax.f32 %v417_v1, 0.0 }
  0xbc   :  { %v428_v7 = vmax.f32 %v409_v3, 0.0 }
  0xbe   :  { %v444_v8 = vpack.c.bf16 %v428_v7, %v427_v6  ;;  %v388_v31 = vpop.f32.mrf.mxu3  ;;  %v250_v46 = vpop.f32.mrf.mxu2  ;;  %v387_v7 = vadd.f32 %v386_v23, %v243_v20  ;;  %v2145_v23 = vld [vmem:[%s2502_s6] ss:$0 sm:$0xff] }
  0xbf   :  { %v223_v9 = vpop.f32.mrf.mxu0  ;;  %v366_v10 = vpop.f32.mrf.mxu1 }
  0xc0   :  { %538 = vmatmul.bf16.gmra.mxu2 %v444_v8  ;;  %v367_v13 = vadd.f32 %v366_v10, %v223_v9  ;;  %v389_v8 = vadd.f32 %v388_v31, %v245_v29  ;;  %v418_v9 = vadd.f32 %v2118_v38, %v387_v7  ;;  %v1742_v7 = vld [vmem:[%s2505_s9 + $0x44] sm:$0xf0] }
  0xc2   :  { %v410_v17 = vadd.f32 %v2118_v38, %v367_v13  ;;  %v419_v4 = vadd.f32 %v2118_v38, %v389_v8  ;;  %v437_v10 = vmax.f32 %v418_v9, 0.0 }
  0xc4   :  { %v429_v21 = vmax.f32 %v410_v17, 0.0  ;;  %v438_v11 = vmax.f32 %v419_v4, 0.0 }
  0xc6   :  { %v391_v44 = vpop.f32.mrf.mxu3  ;;  %v253_v53 = vpop.f32.mrf.mxu2  ;;  %v449_v12 = vpack.c.bf16 %v438_v11, %v437_v10  ;;  %v1740_v10 = vld [vmem:[%s2505_s9 + $0x34] sm:$0xf0] }
  0xc7   :  { %v225_v15 = vpop.f32.mrf.mxu0  ;;  %v368_v16 = vpop.f32.mrf.mxu1  ;;  %v392_v13 = vadd.f32 %v391_v44, %v248_v37  ;;  %v1661_v11 = vor.u32 %v1740_v10, %v1660_v5 }
  0xc8   :  { %v369_v18 = vadd.f32 %v368_v16, %v225_v15 }
  0xc9   :  { %v420_v15 = vadd.f32 %v2118_v38, %v392_v13 }
  0xca   :  { %v411_v19 = vadd.f32 %v2118_v38, %v369_v18 }
  0xcb   :  { %v439_v17 = vmax.f32 %v420_v15, 0.0 }
  0xcc   :  { %v430_v22 = vmax.f32 %v411_v19, 0.0 }
  0xce   :  { %v445_v25 = vpack.c.bf16 %v430_v22, %v429_v21  ;;  %v393_v52 = vpop.f32.mrf.mxu3  ;;  %v255_v63 = vpop.f32.mrf.mxu2 }
  0xcf   :  { %v228_v26 = vpop.f32.mrf.mxu0  ;;  %v371_v27 = vpop.f32.mrf.mxu1  ;;  %v394_v14 = vadd.f32 %v393_v52, %v250_v46 }
  0xd0   :  { %543 = vmatmul.bf16.gmra.mxu2 %v445_v25  ;;  %v372_v30 = vadd.f32 %v371_v27, %v228_v26 }
  0xd1   :  { %v421_v16 = vadd.f32 %v2118_v38, %v394_v14 }
  0xd2   :  { %v412_v34 = vadd.f32 %v2118_v38, %v372_v30 }
  0xd3   :  { %v440_v18 = vmax.f32 %v421_v16, 0.0 }
  0xd4   :  { %v431_v39 = vmax.f32 %v412_v34, 0.0 }
  0xd5   :  { %v450_v19 = vpack.c.bf16 %v440_v18, %v439_v17  ;;  %v1747_v18 = vld [vmem:[%s2505_s9 + $0x74] sm:$0xf] }
  0xd7   :  { %v230_v32 = vpop.f32.mrf.mxu0  ;;  %v373_v33 = vpop.f32.mrf.mxu1 }
  0xd8   :  { %v374_v35 = vadd.f32 %v373_v33, %v230_v32 }
  0xda   :  { %v413_v36 = vadd.f32 %v2118_v38, %v374_v35 }
  0xdc   :  { %v432_v40 = vmax.f32 %v413_v36, 0.0 }
  0xde   :  { %v446_v41 = vpack.c.bf16 %v432_v40, %v431_v39  ;;  %v1692_v40 = vld [vmem:[%s2505_s9 + $0x70] sm:$0xf] }
  0xdf   :  { %v233_v42 = vpop.f32.mrf.mxu0 }
  0xe0   :  { %548 = vmatmul.bf16.gmra.mxu2 %v446_v41  ;;  %v377_v47 = vadd.f32 %v2124_v55, %v233_v42  ;;  %v396_v55 = vpop.f32.mrf.mxu3  ;;  %v1748_v41 = vld [vmem:[%s2505_s9 + $0x74] sm:$0xf0] }
  0xe1   :  { %v397_v20 = vadd.f32 %v396_v55, %v253_v53  ;;  %v1693_v42 = vor.u32 %v1748_v41, %v1692_v40  ;;  %v1677_v55 = vor.u32 %v1744_v62, %v1676_v60  ;;  %v1644_v41 = vld [vmem:[%s2505_s9 + $0x10] sm:$0xf]  ;;  %v1636_v60 = vld [vmem:[%s2505_s9] sm:$0xf]  ;;  %v1734_v62 = vld [vmem:[%s2505_s9 + $0x4] sm:$0xf0] }
  0xe2   :  { %v414_v49 = vadd.f32 %v2118_v38, %v377_v47 }
  0xe3   :  { %v422_v22 = vadd.f32 %v2118_v38, %v397_v20  ;;  %864 = vmatpush.bf16.msrb.mxu0 %v1693_v42  ;;  %1751 = vmatpush.bf16.msra.mxu2 %v1693_v42  ;;  %v1736_v42 = vld [vmem:[%s2505_s9 + $0x14] sm:$0xf0] }
  0xe4   :  { %v433_v54 = vmax.f32 %v414_v49, 0.0 }
  0xe5   :  { %v441_v24 = vmax.f32 %v422_v22, 0.0  ;;  %v1652_v22 = vld [vmem:[%s2505_s9 + $0x20] sm:$0xf] }
  0xe7   :  { %v235_v48 = vpop.f32.mrf.mxu0  ;;  %v451_v28 = vpack.c.bf16 %v441_v24, %v441_v24  ;;  %v1738_v24 = vld [vmem:[%s2505_s9 + $0x24] sm:$0xf0] }
  0xe8   :  { %v379_v50 = vadd.f32 %v378_v61, %v235_v48  ;;  %v435_v61 = vmax.f32 %v416_v0, 0.0  ;;  %v398_v3 = vpop.f32.mrf.mxu3 }
  0xea   :  { %v415_v51 = vadd.f32 %v2118_v38, %v379_v50  ;;  %v448_v6 = vpack.c.bf16 %v436_v2, %v435_v61  ;;  %v1684_v50 = vld [vmem:[%s2505_s9 + $0x60] sm:$0xf] }
  0xec   :  { %v434_v56 = vmax.f32 %v415_v51, 0.0  ;;  %v1746_v51 = vld [vmem:[%s2505_s9 + $0x64] sm:$0xf0] }
  0xed   :  { %v1685_v52 = vor.u32 %v1746_v51, %v1684_v50 }
  0xee   :  { %v447_v57 = vpack.c.bf16 %v434_v56, %v433_v54 }
  0xef   :  { %865 = vmatpush.bf16.msrb.mxu0 %v1685_v52  ;;  %1752 = vmatpush.bf16.msra.mxu2 %v1685_v52  ;;  %v1735_v52 = vld [vmem:[%s2505_s9 + $0x14] sm:$0xf] }
  0xf0   :  { %553 = vmatmul.bf16.gmra.mxu2 %v447_v57 }
  0xf3   :  { %866 = vmatpush.bf16.msrb.mxu0 %v1677_v55  ;;  %1753 = vmatpush.bf16.msra.mxu2 %v1677_v55  ;;  %v1733_v55 = vld [vmem:[%s2505_s9 + $0x4] sm:$0xf] }
 0x100   :  { %558 = vmatmul.bf16.gmra.mxu2 %v448_v6  ;;  %v1668_v6 = vld [vmem:[%s2505_s9 + $0x40] sm:$0xf] }
 0x101   :  { %v1669_v8 = vor.u32 %v1742_v7, %v1668_v6 }
 0x103   :  { %867 = vmatpush.bf16.msrb.mxu0 %v1669_v8  ;;  %1754 = vmatpush.bf16.msra.mxu2 %v1669_v8 }
 0x107   :  { %868 = vmatpush.bf16.msrb.mxu0 %v1661_v11  ;;  %1755 = vmatpush.bf16.msra.mxu2 %v1661_v11 }
 0x110   :  { %563 = vmatmul.bf16.gmra.mxu2 %v449_v12 }
 0x120   :  { %568 = vmatmul.bf16.gmra.mxu2 %v450_v19  ;;  %v1694_v19 = vld [vmem:[%s2505_s9 + $0x78] sm:$0xf0] }
 0x123   :  { %v529_v21 = vpop.f32.mrf.mxu2 }
 0x124   :  { %v530_v25 = vadd.f32 %v2145_v23, %v529_v21  ;;  %v1697_v21 = vor.u32 %v1747_v18, %v1694_v19 }
 0x126   :  { %v578_v29 = vmax.f32 %v530_v25, 0.0  ;;  %922 = vmatpush.bf16.msrb.mxu1 %v1697_v21  ;;  %v1653_v25 = vor.u32 %v1738_v24, %v1652_v22 }
 0x128   :  { %869 = vmatpush.bf16.msrb.mxu0 %v1653_v25  ;;  %1756 = vmatpush.bf16.msra.mxu2 %v1653_v25 }
 0x12b   :  { %v531_v26 = vpop.f32.mrf.mxu2 }
 0x12c   :  { %v532_v27 = vadd.f32 %v2145_v23, %v531_v26  ;;  %v1745_v26 = vld [vmem:[%s2505_s9 + $0x64] sm:$0xf] }
 0x12e   :  { %v579_v30 = vmax.f32 %v532_v27, 0.0  ;;  %v1686_v27 = vld [vmem:[%s2505_s9 + $0x68] sm:$0xf0] }
 0x130   :  { %v597_v31 = vpack.c.bf16 %v579_v30, %v578_v29  ;;  %573 = vmatmul.bf16.gmra.mxu2 %v451_v28  ;;  %v1689_v28 = vor.u32 %v1745_v26, %v1686_v27  ;;  %v1743_v30 = vld [vmem:[%s2505_s9 + $0x54] sm:$0xf] }
 0x132   :  { %683 = vmatmul.bf16.vlgmr.msrb.gmra.mxu3 %v597_v31  ;;  %923 = vmatpush.bf16.msrb.mxu1 %v1689_v28  ;;  %v1678_v31 = vld [vmem:[%s2505_s9 + $0x58] sm:$0xf0] }
 0x133   :  { %v534_v32 = vpop.f32.mrf.mxu2 }
 0x134   :  { %v535_v38 = vadd.f32 %v2145_v23, %v534_v32 }
 0x136   :  { %v580_v35 = vmax.f32 %v535_v38, 0.0  ;;  %v1681_v38 = vor.u32 %v1743_v30, %v1678_v31 }
 0x138   :  { %924 = vmatpush.bf16.msrb.mxu1 %v1681_v38 }
 0x13b   :  { %v536_v33 = vpop.f32.mrf.mxu2 }
 0x13c   :  { %v537_v34 = vadd.f32 %v2145_v23, %v536_v33 }
 0x13e   :  { %v581_v36 = vmax.f32 %v537_v34, 0.0 }
 0x140   :  { %v598_v37 = vpack.c.bf16 %v581_v36, %v580_v35  ;;  %v1741_v36 = vld [vmem:[%s2505_s9 + $0x44] sm:$0xf] }
 0x142   :  { %688 = vmatmul.bf16.gmra.mxu3 %v598_v37  ;;  %v1670_v37 = vld [vmem:[%s2505_s9 + $0x48] sm:$0xf0] }
 0x143   :  { %v539_v39 = vpop.f32.mrf.mxu2 }
 0x144   :  { %v540_v43 = vadd.f32 %v2145_v23, %v539_v39  ;;  %v1673_v39 = vor.u32 %v1741_v36, %v1670_v37 }
 0x146   :  { %v582_v46 = vmax.f32 %v540_v43, 0.0  ;;  %925 = vmatpush.bf16.msrb.mxu1 %v1673_v39  ;;  %v1739_v43 = vld [vmem:[%s2505_s9 + $0x34] sm:$0xf] }
 0x14b   :  { %v541_v44 = vpop.f32.mrf.mxu2 }
 0x14c   :  { %v542_v45 = vadd.f32 %v2145_v23, %v541_v44 }
 0x14e   :  { %v583_v47 = vmax.f32 %v542_v45, 0.0  ;;  %v1645_v45 = vor.u32 %v1736_v42, %v1644_v41 }
 0x150   :  { %v599_v48 = vpack.c.bf16 %v583_v47, %v582_v46  ;;  %v1662_v46 = vld [vmem:[%s2505_s9 + $0x38] sm:$0xf0]  ;;  %870 = vmatpush.bf16.msrb.mxu0 %v1645_v45  ;;  %1757 = vmatpush.bf16.msra.mxu2 %v1645_v45 }
 0x151   :  { %v1665_v47 = vor.u32 %v1739_v43, %v1662_v46 }
 0x152   :  { %693 = vmatmul.bf16.gmra.mxu3 %v599_v48  ;;  %v1737_v48 = vld [vmem:[%s2505_s9 + $0x24] sm:$0xf] }
 0x153   :  { %v544_v49 = vpop.f32.mrf.mxu2  ;;  %926 = vmatpush.bf16.msrb.mxu1 %v1665_v47 }
 0x154   :  { %v545_v53 = vadd.f32 %v2145_v23, %v544_v49  ;;  %v1654_v49 = vld [vmem:[%s2505_s9 + $0x28] sm:$0xf0] }
 0x155   :  { %v1657_v50 = vor.u32 %v1737_v48, %v1654_v49 }
 0x156   :  { %v584_v57 = vmax.f32 %v545_v53, 0.0  ;;  %v1646_v53 = vld [vmem:[%s2505_s9 + $0x18] sm:$0xf0] }
 0x157   :  { %927 = vmatpush.bf16.msrb.mxu1 %v1657_v50 }
 0x15b   :  { %v546_v54 = vpop.f32.mrf.mxu2 }
 0x15c   :  { %v547_v56 = vadd.f32 %v2145_v23, %v546_v54 }
 0x15e   :  { %v585_v58 = vmax.f32 %v547_v56, 0.0  ;;  %v1649_v56 = vor.u32 %v1735_v52, %v1646_v53 }
 0x160   :  { %v600_v59 = vpack.c.bf16 %v585_v58, %v584_v57  ;;  %928 = vmatpush.bf16.msrb.mxu1 %v1649_v56 }
 0x162   :  { %698 = vmatmul.bf16.gmra.mxu3 %v600_v59 }
 0x163   :  { %v549_v63 = vpop.f32.mrf.mxu2 }
 0x164   :  { %v550_v0 = vadd.f32 %v2145_v23, %v549_v63  ;;  %v1637_v63 = vor.u32 %v1734_v62, %v1636_v60 }
 0x166   :  { %v586_v2 = vmax.f32 %v550_v0, 0.0  ;;  %v1638_v0 = vld [vmem:[%s2505_s9 + $0x8] sm:$0xf0]  ;;  %871 = vmatpush.bf16.msrb.mxu0 %v1637_v63  ;;  %1758 = vmatpush.bf16.msra.mxu2 %v1637_v63 }
 0x16b   :  { %v551_v1 = vpop.f32.mrf.mxu2 }
 0x16c   :  { %v552_v61 = vadd.f32 %v2145_v23, %v551_v1 }
 0x16e   :  { %v587_v3 = vmax.f32 %v552_v61, 0.0  ;;  %v1641_v61 = vor.u32 %v1733_v55, %v1638_v0 }
 0x170   :  { %v601_v9 = vpack.c.bf16 %v587_v3, %v586_v2  ;;  %929 = vmatpush.bf16.msrb.mxu1 %v1641_v61 }
 0x172   :  { %703 = vmatmul.bf16.gmra.mxu3 %v601_v9 }
 0x173   :  { %v554_v4 = vpop.f32.mrf.mxu2 }
 0x174   :  { %v555_v12 = vadd.f32 %v2145_v23, %v554_v4 }
 0x176   :  { %v588_v15 = vmax.f32 %v555_v12, 0.0  ;;  %v2265_v12 = vld [vmem:[%s2504_s8] ss:$0 sm:$0xff] }
 0x17b   :  { %v556_v13 = vpop.f32.mrf.mxu2 }
 0x17c   :  { %v557_v14 = vadd.f32 %v2145_v23, %v556_v13 }
 0x17e   :  { %v589_v16 = vmax.f32 %v557_v14, 0.0 }
 0x180   :  { %v602_v17 = vpack.c.bf16 %v589_v16, %v588_v15 }
 0x182   :  { %708 = vmatmul.bf16.gmra.mxu3 %v602_v17 }
 0x183   :  { %v559_v20 = vpop.f32.mrf.mxu2 }
 0x184   :  { %v560_v29 = vadd.f32 %v2145_v23, %v559_v20 }
 0x186   :  { %v590_v34 = vmax.f32 %v560_v29, 0.0 }
 0x18b   :  { %v561_v32 = vpop.f32.mrf.mxu2 }
 0x18c   :  { %v562_v33 = vadd.f32 %v2145_v23, %v561_v32 }
 0x18e   :  { %v591_v35 = vmax.f32 %v562_v33, 0.0 }
 0x190   :  { %v603_v40 = vpack.c.bf16 %v591_v35, %v590_v34 }
 0x192   :  { %713 = vmatmul.bf16.gmra.mxu3 %v603_v40 }
 0x193   :  { %v564_v44 = vpop.f32.mrf.mxu2 }
 0x194   :  { %v565_v51 = vadd.f32 %v2145_v23, %v564_v44 }
 0x196   :  { %v592_v58 = vmax.f32 %v565_v51, 0.0 }
 0x19b   :  { %v566_v54 = vpop.f32.mrf.mxu2 }
 0x19c   :  { %v567_v57 = vadd.f32 %v2145_v23, %v566_v54 }
 0x19e   :  { %v593_v59 = vmax.f32 %v567_v57, 0.0 }
 0x1a0   :  { %v604_v1 = vpack.c.bf16 %v593_v59, %v592_v58 }
 0x1a2   :  { %718 = vmatmul.bf16.gmra.mxu3 %v604_v1 }
 0x1a3   :  { %v569_v2 = vpop.f32.mrf.mxu2 }
 0x1a4   :  { %v570_v3 = vadd.f32 %v2145_v23, %v569_v2 }
 0x1a6   :  { %v594_v8 = vmax.f32 %v570_v3, 0.0 }
 0x1ab   :  { %v571_v6 = vpop.f32.mrf.mxu2 }
 0x1ac   :  { %v572_v7 = vadd.f32 %v2145_v23, %v571_v6 }
 0x1ae   :  { %v595_v9 = vmax.f32 %v572_v7, 0.0 }
 0x1b0   :  { %v605_v4 = vpack.c.bf16 %v595_v9, %v594_v8 }
 0x1b2   :  { %723 = vmatmul.bf16.gmra.mxu3 %v605_v4  ;;  %v778_v4 = vld [vmem:[%s2506_s10] sm:$0x3]  ;;  %s1954_s10 = smov [#allocation8]  }
 0x1b3   :  { %v574_v5 = vpop.f32.mrf.mxu2  ;;  %s1453_s25 = sshll.u32 %s1954_s10, 4  ;;  %s1454_s25 = int_to_ptr.vmem [resolvable:$true] %s1453_s25 }
 0x1b4   :  { %v575_v11 = vadd.f32 %v2145_v23, %v574_v5 }
 0x1b5   :  { %v684_v10 = vpop.f32.mrf.mxu3 }
 0x1b6   :  { %v596_v14 = vmax.f32 %v575_v11, 0.0  ;;  %v685_v15 = vadd.f32 %v2265_v12, %v684_v10 }
 0x1b8   :  { %v606_v18 = vpack.c.bf16 %v596_v14, %v596_v14  ;;  %v733_v19 = vmax.f32 %v685_v15, 0.0  ;;  %v2290_v14 = vperm.slane %v778_v4, 1 }
 0x1bb   :  { %v576_v13 = vpop.f32.mrf.mxu2 }
 0x1bc   :  { %v2288_v13 = vperm.slane %v778_v4, 0 }
 0x1bd   :  { %v686_v16 = vpop.f32.mrf.mxu3 }
 0x1be   :  { %v687_v17 = vadd.f32 %v2265_v12, %v686_v16 }
 0x1c0   :  { %v734_v20 = vmax.f32 %v687_v17, 0.0 }
 0x1c2   :  { %v752_v21 = vpack.c.bf16 %v734_v20, %v733_v19  ;;  %728 = vmatmul.bf16.gmra.mxu3 %v606_v18 }
 0x1c4   :  { %872 = vmatmul.bf16.vlgmr.msrb.gmra.mxu0 %v752_v21  ;;  %930 = vmatmul.bf16.vlgmr.msrb.gmra.mxu1 %v752_v21 }
 0x1c5   :  { %v689_v23 = vpop.f32.mrf.mxu3 }
 0x1c6   :  { %v690_v22 = vadd.f32 %v2265_v12, %v689_v23 }
 0x1c8   :  { %v735_v26 = vmax.f32 %v690_v22, 0.0 }
 0x1cd   :  { %v691_v24 = vpop.f32.mrf.mxu3 }
 0x1ce   :  { %v692_v25 = vadd.f32 %v2265_v12, %v691_v24 }
 0x1d0   :  { %v736_v27 = vmax.f32 %v692_v25, 0.0 }
 0x1d2   :  { %v753_v28 = vpack.c.bf16 %v736_v27, %v735_v26 }
 0x1d4   :  { %877 = vmatmul.bf16.gmra.mxu0 %v753_v28  ;;  %935 = vmatmul.bf16.gmra.mxu1 %v753_v28 }
 0x1d5   :  { %v694_v29 = vpop.f32.mrf.mxu3 }
 0x1d6   :  { %v695_v30 = vadd.f32 %v2265_v12, %v694_v29 }
 0x1d8   :  { %v737_v38 = vmax.f32 %v695_v30, 0.0 }
 0x1dd   :  { %v696_v31 = vpop.f32.mrf.mxu3 }
 0x1de   :  { %v697_v32 = vadd.f32 %v2265_v12, %v696_v31 }
 0x1e0   :  { %v738_v33 = vmax.f32 %v697_v32, 0.0 }
 0x1e2   :  { %v754_v34 = vpack.c.bf16 %v738_v33, %v737_v38 }
 0x1e4   :  { %882 = vmatmul.bf16.gmra.mxu0 %v754_v34  ;;  %940 = vmatmul.bf16.gmra.mxu1 %v754_v34 }
 0x1e5   :  { %v699_v35 = vpop.f32.mrf.mxu3 }
 0x1e6   :  { %v700_v36 = vadd.f32 %v2265_v12, %v699_v35 }
 0x1e8   :  { %v739_v40 = vmax.f32 %v700_v36, 0.0 }
 0x1ed   :  { %v701_v37 = vpop.f32.mrf.mxu3 }
 0x1ee   :  { %v702_v39 = vadd.f32 %v2265_v12, %v701_v37 }
 0x1f0   :  { %v740_v41 = vmax.f32 %v702_v39, 0.0 }
 0x1f2   :  { %v755_v42 = vpack.c.bf16 %v740_v41, %v739_v40 }
 0x1f4   :  { %887 = vmatmul.bf16.gmra.mxu0 %v755_v42  ;;  %945 = vmatmul.bf16.gmra.mxu1 %v755_v42 }
 0x1f5   :  { %v704_v43 = vpop.f32.mrf.mxu3 }
 0x1f6   :  { %v705_v44 = vadd.f32 %v2265_v12, %v704_v43 }
 0x1f8   :  { %v741_v47 = vmax.f32 %v705_v44, 0.0 }
 0x1fd   :  { %v706_v45 = vpop.f32.mrf.mxu3 }
 0x1fe   :  { %v707_v46 = vadd.f32 %v2265_v12, %v706_v45 }
 0x200   :  { %v742_v48 = vmax.f32 %v707_v46, 0.0 }
 0x202   :  { %v756_v49 = vpack.c.bf16 %v742_v48, %v741_v47 }
 0x204   :  { %892 = vmatmul.bf16.gmra.mxu0 %v756_v49  ;;  %950 = vmatmul.bf16.gmra.mxu1 %v756_v49 }
 0x205   :  { %v709_v50 = vpop.f32.mrf.mxu3 }
 0x206   :  { %v710_v51 = vadd.f32 %v2265_v12, %v709_v50 }
 0x208   :  { %v743_v54 = vmax.f32 %v710_v51, 0.0 }
 0x20d   :  { %v711_v52 = vpop.f32.mrf.mxu3 }
 0x20e   :  { %v712_v53 = vadd.f32 %v2265_v12, %v711_v52 }
 0x210   :  { %v744_v56 = vmax.f32 %v712_v53, 0.0 }
 0x212   :  { %v757_v57 = vpack.c.bf16 %v744_v56, %v743_v54 }
 0x214   :  { %897 = vmatmul.bf16.gmra.mxu0 %v757_v57  ;;  %955 = vmatmul.bf16.gmra.mxu1 %v757_v57 }
 0x215   :  { %v714_v58 = vpop.f32.mrf.mxu3 }
 0x216   :  { %v715_v59 = vadd.f32 %v2265_v12, %v714_v58 }
 0x218   :  { %v745_v63 = vmax.f32 %v715_v59, 0.0 }
 0x21d   :  { %v716_v60 = vpop.f32.mrf.mxu3 }
 0x21e   :  { %v717_v62 = vadd.f32 %v2265_v12, %v716_v60 }
 0x220   :  { %v746_v55 = vmax.f32 %v717_v62, 0.0 }
 0x222   :  { %v758_v0 = vpack.c.bf16 %v746_v55, %v745_v63 }
 0x224   :  { %902 = vmatmul.bf16.gmra.mxu0 %v758_v0  ;;  %960 = vmatmul.bf16.gmra.mxu1 %v758_v0 }
 0x225   :  { %v719_v1 = vpop.f32.mrf.mxu3 }
 0x226   :  { %v720_v61 = vadd.f32 %v2265_v12, %v719_v1 }
 0x228   :  { %v747_v6 = vmax.f32 %v720_v61, 0.0 }
 0x22d   :  { %v721_v2 = vpop.f32.mrf.mxu3 }
 0x22e   :  { %v722_v3 = vadd.f32 %v2265_v12, %v721_v2 }
 0x230   :  { %v748_v7 = vmax.f32 %v722_v3, 0.0 }
 0x232   :  { %v759_v8 = vpack.c.bf16 %v748_v7, %v747_v6 }
 0x234   :  { %907 = vmatmul.bf16.gmra.mxu0 %v759_v8  ;;  %965 = vmatmul.bf16.gmra.mxu1 %v759_v8 }
 0x235   :  { %v724_v9 = vpop.f32.mrf.mxu3 }
 0x236   :  { %v725_v5 = vadd.f32 %v2265_v12, %v724_v9 }
 0x238   :  { %v749_v15 = vmax.f32 %v725_v5, 0.0 }
 0x23d   :  { %v726_v10 = vpop.f32.mrf.mxu3 }
 0x23e   :  { %v727_v11 = vadd.f32 %v2265_v12, %v726_v10 }
 0x240   :  { %v750_v16 = vmax.f32 %v727_v11, 0.0 }
 0x241   :  { %v873_v17 = vpop.f32.mrf.mxu0  ;;  %v931_v18 = vpop.f32.mrf.mxu1 }
 0x242   :  { %v760_v19 = vpack.c.bf16 %v750_v16, %v749_v15  ;;  %v2293_v20 = vadd.f32 %v873_v17, %v2288_v13  ;;  %v932_v21 = vadd.f32 %v931_v18, %v2290_v14 }
 0x244   :  { %1417 = vst [vmem:[#allocation8] sm:$0xff] %v932_v21  ;;  %912 = vmatmul.bf16.gmra.mxu0 %v760_v19  ;;  %970 = vmatmul.bf16.gmra.mxu1 %v760_v19 }
 0x245   :  { %980 = vmax.xlane.f32.xlu0 %v2293_v20  ;;  %v729_v23 = vpop.f32.mrf.mxu3 }
 0x246   :  { %v730_v22 = vadd.f32 %v2265_v12, %v729_v23 }
 0x248   :  { %v751_v24 = vmax.f32 %v730_v22, 0.0 }
 0x249   :  { %v875_v25 = vpop.f32.mrf.mxu0  ;;  %v933_v26 = vpop.f32.mrf.mxu1 }
 0x24a   :  { %v761_v27 = vpack.c.bf16 %v751_v24, %v751_v24  ;;  %v2299_v28 = vadd.f32 %v875_v25, %v2288_v13  ;;  %v934_v29 = vadd.f32 %v933_v26, %v2290_v14 }
 0x24c   :  { %1418 = vst [vmem:[#allocation8 + $0x8] sm:$0xff] %v934_v29  ;;  %917 = vmatmul.bf16.vlgmr.msra.gmra.mxu2 %v761_v27 }
 0x24d   :  { %982 = vmax.xlane.f32.xlu0 %v2299_v28  ;;  %v731_v30 = vpop.f32.mrf.mxu3 }
 0x251   :  { %v878_v31 = vpop.f32.mrf.mxu0  ;;  %v936_v32 = vpop.f32.mrf.mxu1 }
 0x252   :  { %v2304_v38 = vadd.f32 %v878_v31, %v2288_v13  ;;  %v937_v12 = vadd.f32 %v936_v32, %v2290_v14 }
 0x254   :  { %1419 = vst [vmem:[#allocation8 + $0x10] sm:$0xff] %v937_v12  ;;  %975 = vmatmul.bf16.gmra.mxu1 %v761_v27  ;;  %984 = vmax.xlane.f32.xlu1 %v2304_v38 }
 0x259   :  { %v880_v33 = vpop.f32.mrf.mxu0  ;;  %v938_v34 = vpop.f32.mrf.mxu1 }
 0x25a   :  { %v2309_v35 = vadd.f32 %v880_v33, %v2288_v13  ;;  %v939_v36 = vadd.f32 %v938_v34, %v2290_v14 }
 0x25c   :  { %1420 = vst [vmem:[#allocation8 + $0x18] sm:$0xff] %v939_v36  ;;  %986 = vmax.xlane.f32.xlu1 %v2309_v35 }
 0x261   :  { %v883_v37 = vpop.f32.mrf.mxu0  ;;  %v941_v39 = vpop.f32.mrf.mxu1 }
 0x262   :  { %v2314_v40 = vadd.f32 %v883_v37, %v2288_v13  ;;  %v942_v41 = vadd.f32 %v941_v39, %v2290_v14 }
 0x264   :  { %1421 = vst [vmem:[#allocation8 + $0x20] sm:$0xff] %v942_v41  ;;  %988 = vmax.xlane.f32.xlu2 %v2314_v40 }
 0x269   :  { %v885_v42 = vpop.f32.mrf.mxu0  ;;  %v943_v43 = vpop.f32.mrf.mxu1 }
 0x26a   :  { %v2319_v44 = vadd.f32 %v885_v42, %v2288_v13  ;;  %v944_v45 = vadd.f32 %v943_v43, %v2290_v14 }
 0x26c   :  { %1422 = vst [vmem:[#allocation8 + $0x28] sm:$0xff] %v944_v45  ;;  %990 = vmax.xlane.f32.xlu2 %v2319_v44 }
 0x271   :  { %v888_v46 = vpop.f32.mrf.mxu0  ;;  %v946_v47 = vpop.f32.mrf.mxu1 }
 0x272   :  { %v2324_v48 = vadd.f32 %v888_v46, %v2288_v13  ;;  %v947_v49 = vadd.f32 %v946_v47, %v2290_v14 }
 0x274   :  { %1423 = vst [vmem:[#allocation8 + $0x30] sm:$0xff] %v947_v49  ;;  %992 = vmax.xlane.f32.xlu0 %v2324_v48 }
 0x279   :  { %v890_v50 = vpop.f32.mrf.mxu0  ;;  %v948_v51 = vpop.f32.mrf.mxu1 }
 0x27a   :  { %v2329_v52 = vadd.f32 %v890_v50, %v2288_v13  ;;  %v949_v53 = vadd.f32 %v948_v51, %v2290_v14 }
 0x27c   :  { %1424 = vst [vmem:[#allocation8 + $0x38] sm:$0xff] %v949_v53  ;;  %994 = vmax.xlane.f32.xlu1 %v2329_v52 }
 0x281   :  { %v893_v54 = vpop.f32.mrf.mxu0  ;;  %v951_v56 = vpop.f32.mrf.mxu1 }
 0x282   :  { %v2334_v57 = vadd.f32 %v893_v54, %v2288_v13  ;;  %v952_v58 = vadd.f32 %v951_v56, %v2290_v14 }
 0x284   :  { %1425 = vst [vmem:[#allocation8 + $0x40] sm:$0xff] %v952_v58  ;;  %996 = vmax.xlane.f32.xlu2 %v2334_v57 }
 0x289   :  { %v895_v59 = vpop.f32.mrf.mxu0  ;;  %v953_v60 = vpop.f32.mrf.mxu1 }
 0x28a   :  { %v2339_v62 = vadd.f32 %v895_v59, %v2288_v13  ;;  %v954_v63 = vadd.f32 %v953_v60, %v2290_v14 }
 0x28c   :  { %1426 = vst [vmem:[#allocation8 + $0x48] sm:$0xff] %v954_v63  ;;  %998 = vmax.xlane.f32.xlu0 %v2339_v62 }
 0x291   :  { %v898_v55 = vpop.f32.mrf.mxu0  ;;  %v956_v0 = vpop.f32.mrf.mxu1 }
 0x292   :  { %v2344_v1 = vadd.f32 %v898_v55, %v2288_v13  ;;  %v957_v61 = vadd.f32 %v956_v0, %v2290_v14 }
 0x294   :  { %1427 = vst [vmem:[#allocation8 + $0x50] sm:$0xff] %v957_v61  ;;  %1000 = vmax.xlane.f32.xlu1 %v2344_v1 }
 0x299   :  { %v900_v2 = vpop.f32.mrf.mxu0  ;;  %v958_v3 = vpop.f32.mrf.mxu1 }
 0x29a   :  { %v2349_v6 = vadd.f32 %v900_v2, %v2288_v13  ;;  %v959_v7 = vadd.f32 %v958_v3, %v2290_v14 }
 0x29c   :  { %1428 = vst [vmem:[#allocation8 + $0x58] sm:$0xff] %v959_v7  ;;  %1002 = vmax.xlane.f32.xlu2 %v2349_v6 }
 0x2a1   :  { %v903_v8 = vpop.f32.mrf.mxu0  ;;  %v961_v9 = vpop.f32.mrf.mxu1 }
 0x2a2   :  { %v2354_v4 = vadd.f32 %v903_v8, %v2288_v13  ;;  %v962_v5 = vadd.f32 %v961_v9, %v2290_v14 }
 0x2a4   :  { %1429 = vst [vmem:[#allocation8 + $0x60] sm:$0xff] %v962_v5  ;;  %1004 = vmax.xlane.f32.xlu0 %v2354_v4 }
 0x2a9   :  { %v905_v10 = vpop.f32.mrf.mxu0  ;;  %v963_v11 = vpop.f32.mrf.mxu1 }
 0x2aa   :  { %v2359_v15 = vadd.f32 %v905_v10, %v2288_v13  ;;  %v964_v16 = vadd.f32 %v963_v11, %v2290_v14 }
 0x2ac   :  { %1430 = vst [vmem:[#allocation8 + $0x68] sm:$0xff] %v964_v16  ;;  %1006 = vmax.xlane.f32.xlu1 %v2359_v15 }
 0x2b1   :  { %v908_v17 = vpop.f32.mrf.mxu0  ;;  %v966_v18 = vpop.f32.mrf.mxu1 }
 0x2b2   :  { %v2364_v19 = vadd.f32 %v908_v17, %v2288_v13  ;;  %v967_v21 = vadd.f32 %v966_v18, %v2290_v14 }
 0x2b4   :  { %1431 = vst [vmem:[#allocation8 + $0x70] sm:$0xff] %v967_v21  ;;  %1008 = vmax.xlane.f32.xlu2 %v2364_v19 }
 0x2b8   :  { %v981_v23 = vpop.xlane.xlu0 %980 }
 0x2b9   :  { %v910_v22 = vpop.f32.mrf.mxu0  ;;  %v968_v24 = vpop.f32.mrf.mxu1  ;;  %v1018_v27 = vsub.f32 %v2293_v20, %v981_v23 }
 0x2ba   :  { %v2369_v25 = vadd.f32 %v910_v22, %v2288_v13  ;;  %v969_v26 = vadd.f32 %v968_v24, %v2290_v14 }
 0x2bb   :  { %v1037_v29 = vmul.f32 1.442695, %v1018_v27 }
 0x2bc   :  { %1432 = vst [vmem:[#allocation8 + $0x78] sm:$0xff] %v969_v26  ;;  %1010 = vmax.xlane.f32.xlu0 %v2369_v25 }
 0x2bd   :  { %1770 = vpow2.f32 %v1037_v29 }
 0x2c0   :  { %v983_v32 = vpop.xlane.xlu0 %982 }
 0x2c1   :  { %v913_v30 = vpop.f32.mrf.mxu0  ;;  %v971_v31 = vpop.f32.mrf.mxu1  ;;  %v1019_v34 = vsub.f32 %v2299_v28, %v983_v32 }
 0x2c2   :  { %v2375_v12 = vadd.f32 %v913_v30, %v2288_v13  ;;  %v972_v33 = vadd.f32 %v971_v31, %v2290_v14 }
 0x2c3   :  { %v1039_v37 = vmul.f32 1.442695, %v1019_v34  ;;  %v2384_v43 = vpop.eup %1770 }
 0x2c4   :  { %1433 = vst [vmem:[#allocation8 + $0x80] sm:$0xff] %v972_v33  ;;  %1012 = vmax.xlane.f32.xlu1 %v2375_v12 }
 0x2c5   :  { %1772 = vpow2.f32 %v1039_v37 }
 0x2c7   :  { %v985_v36 = vpop.xlane.xlu1 %984 }
 0x2c8   :  { %v1020_v45 = vsub.f32 %v2304_v38, %v985_v36 }
 0x2c9   :  { %v915_v39 = vpop.f32.mrf.mxu0  ;;  %v973_v41 = vpop.f32.mrf.mxu1 }
 0x2ca   :  { %v2381_v20 = vadd.f32 %v915_v39, %v2288_v13  ;;  %v974_v42 = vadd.f32 %v973_v41, %v2290_v14  ;;  %v1041_v28 = vmul.f32 1.442695, %v1020_v45 }
 0x2cb   :  { %v2395_v38 = vpop.eup %1772 }
 0x2cc   :  { %1434 = vst [vmem:[#allocation8 + $0x88] sm:$0xff] %v974_v42  ;;  %1014 = vmax.xlane.f32.xlu2 %v2381_v20  ;;  %1075 = vadd.xlane.f32.xlu1 %v2384_v43  ;;  %1774 = vpow2.f32 %v1041_v28 }
 0x2cf   :  { %v918_v46 = vpop.f32.mrf.mxu2  ;;  %v987_v47 = vpop.xlane.xlu1 %986 }
 0x2d0   :  { %v2390_v49 = vadd.f32 %v918_v46, %v2288_v13  ;;  %v1021_v50 = vsub.f32 %v2309_v35, %v987_v47 }
 0x2d1   :  { %v976_v51 = vpop.f32.mrf.mxu1 }
 0x2d2   :  { %v1043_v53 = vmul.f32 1.442695, %v1021_v50  ;;  %v977_v54 = vadd.f32 %v976_v51, %v2290_v14  ;;  %1016 = vmax.xlane.f32.xlu0 %v2390_v49  ;;  %v2399_v59 = vpop.eup %1774 }
 0x2d4   :  { %1776 = vpow2.f32 %v1043_v53  ;;  %1435 = vst [vmem:[#allocation8 + $0x90] sm:$0xff] %v977_v54  ;;  %1077 = vadd.xlane.f32.xlu2 %v2395_v38 }
 0x2d5   :  { %1461 = dma.vmem_to_hbm [thread:$0]  %s1454_s25, 2432, %s1456_s28, [#allocation9], %s1955_s29, %s1955_s29, %s1956_s30  }
 0x2d7   :  { %v920_v56 = vpop.f32.mrf.mxu2  ;;  %v989_v58 = vpop.xlane.xlu2 %988 }
 0x2d8   :  { %v1022_v13 = vsub.f32 %v2314_v40, %v989_v58 }
 0x2d9   :  { %v978_v35 = vpop.f32.mrf.mxu1 }
 0x2da   :  { %v2401_v60 = vpop.eup %1776  ;;  %v1045_v63 = vmul.f32 1.442695, %v1022_v13  ;;  %1079 = vadd.xlane.f32.xlu0 %v2399_v59 }
 0x2db   :  { %1081 = vadd.xlane.f32.xlu1 %v2401_v60 }
 0x2dc   :  { %1778 = vpow2.f32 %v1045_v63 }
 0x2df   :  { %v991_v14 = vpop.xlane.xlu2 %990 }
 0x2e0   :  { %v1023_v55 = vsub.f32 %v2319_v44, %v991_v14 }
 0x2e2   :  { %v2406_v0 = vpop.eup %1778  ;;  %v1047_v61 = vmul.f32 1.442695, %v1023_v55 }
 0x2e3   :  { %1083 = vadd.xlane.f32.xlu2 %v2406_v0 }
 0x2e4   :  { %1780 = vpow2.f32 %v1047_v61 }
 0x2e7   :  { %v993_v40 = vpop.xlane.xlu0 %992 }
 0x2e8   :  { %v1024_v2 = vsub.f32 %v2324_v48, %v993_v40 }
 0x2ea   :  { %v2410_v3 = vpop.eup %1780  ;;  %v1049_v7 = vmul.f32 1.442695, %v1024_v2 }
 0x2eb   :  { %1085 = vadd.xlane.f32.xlu0 %v2410_v3 }
 0x2ec   :  { %1782 = vpow2.f32 %v1049_v7 }
 0x2ef   :  { %v995_v8 = vpop.xlane.xlu1 %994 }
 0x2f0   :  { %v1025_v9 = vsub.f32 %v2329_v52, %v995_v8 }
 0x2f2   :  { %v2414_v5 = vpop.eup %1782  ;;  %v1051_v44 = vmul.f32 1.442695, %v1025_v9 }
 0x2f3   :  { %1087 = vadd.xlane.f32.xlu1 %v2414_v5 }
 0x2f4   :  { %1784 = vpow2.f32 %v1051_v44 }
 0x2f7   :  { %v997_v10 = vpop.xlane.xlu2 %996 }
 0x2f8   :  { %v1026_v11 = vsub.f32 %v2334_v57, %v997_v10 }
 0x2fa   :  { %v2418_v16 = vpop.eup %1784  ;;  %v1053_v48 = vmul.f32 1.442695, %v1026_v11 }
 0x2fb   :  { %1089 = vadd.xlane.f32.xlu2 %v2418_v16 }
 0x2fc   :  { %1786 = vpow2.f32 %v1053_v48 }
 0x2ff   :  { %v999_v17 = vpop.xlane.xlu0 %998 }
 0x300   :  { %v1027_v18 = vsub.f32 %v2339_v62, %v999_v17 }
 0x302   :  { %v2422_v21 = vpop.eup %1786  ;;  %v1055_v52 = vmul.f32 1.442695, %v1027_v18 }
 0x303   :  { %1091 = vadd.xlane.f32.xlu0 %v2422_v21 }
 0x304   :  { %1788 = vpow2.f32 %v1055_v52 }
 0x307   :  { %v1001_v23 = vpop.xlane.xlu1 %1000 }
 0x308   :  { %v1028_v22 = vsub.f32 %v2344_v1, %v1001_v23 }
 0x30a   :  { %v2426_v24 = vpop.eup %1788  ;;  %v1057_v57 = vmul.f32 1.442695, %v1028_v22 }
 0x30b   :  { %1093 = vadd.xlane.f32.xlu1 %v2426_v24 }
 0x30c   :  { %1790 = vpow2.f32 %v1057_v57 }
 0x30f   :  { %v1003_v26 = vpop.xlane.xlu2 %1002 }
 0x310   :  { %v1029_v27 = vsub.f32 %v2349_v6, %v1003_v26 }
 0x312   :  { %v2430_v29 = vpop.eup %1790  ;;  %v1059_v62 = vmul.f32 1.442695, %v1029_v27 }
 0x313   :  { %1095 = vadd.xlane.f32.xlu2 %v2430_v29 }
 0x314   :  { %1792 = vpow2.f32 %v1059_v62 }
 0x317   :  { %v1005_v30 = vpop.xlane.xlu0 %1004 }
 0x318   :  { %v1030_v31 = vsub.f32 %v2354_v4, %v1005_v30 }
 0x31a   :  { %v2434_v32 = vpop.eup %1792  ;;  %v1061_v1 = vmul.f32 1.442695, %v1030_v31 }
 0x31b   :  { %1097 = vadd.xlane.f32.xlu0 %v2434_v32 }
 0x31c   :  { %1794 = vpow2.f32 %v1061_v1 }
 0x31f   :  { %v1007_v33 = vpop.xlane.xlu1 %1006 }
 0x320   :  { %v1031_v34 = vsub.f32 %v2359_v15, %v1007_v33 }
 0x322   :  { %v2438_v36 = vpop.eup %1794  ;;  %v1063_v6 = vmul.f32 1.442695, %v1031_v34 }
 0x323   :  { %1099 = vadd.xlane.f32.xlu1 %v2438_v36 }
 0x324   :  { %1796 = vpow2.f32 %v1063_v6 }
 0x327   :  { %v1009_v37 = vpop.xlane.xlu2 %1008 }
 0x328   :  { %v1032_v39 = vsub.f32 %v2364_v19, %v1009_v37 }
 0x32a   :  { %v2442_v41 = vpop.eup %1796  ;;  %v1065_v4 = vmul.f32 1.442695, %v1032_v39 }
 0x32b   :  { %1101 = vadd.xlane.f32.xlu2 %v2442_v41 }
 0x32c   :  { %1798 = vpow2.f32 %v1065_v4 }
 0x32f   :  { %v1011_v42 = vpop.xlane.xlu0 %1010 }
 0x330   :  { %v1033_v45 = vsub.f32 %v2369_v25, %v1011_v42 }
 0x332   :  { %v2446_v28 = vpop.eup %1798  ;;  %v1067_v15 = vmul.f32 1.442695, %v1033_v45 }
 0x333   :  { %1103 = vadd.xlane.f32.xlu0 %v2446_v28 }
 0x334   :  { %1800 = vpow2.f32 %v1067_v15 }
 0x337   :  { %v1013_v46 = vpop.xlane.xlu1 %1012 }
 0x338   :  { %v1034_v47 = vsub.f32 %v2375_v12, %v1013_v46 }
 0x33a   :  { %v2450_v50 = vpop.eup %1800  ;;  %v1069_v19 = vmul.f32 1.442695, %v1034_v47 }
 0x33b   :  { %1105 = vadd.xlane.f32.xlu1 %v2450_v50 }
 0x33c   :  { %1802 = vpow2.f32 %v1069_v19 }
 0x33f   :  { %v1015_v51 = vpop.xlane.xlu2 %1014  ;;  %v1076_v53 = vpop.xlane.xlu1 %1075 }
 0x340   :  { %v1035_v54 = vsub.f32 %v2381_v20, %v1015_v51  ;;  %1804 = vrcp.f32 %v1076_v53  ;;  %v1124_v40 = vand.u32 2147483648, %v1076_v53  ;;  %v1122_v2 = vand.u32 2147483647, %v1076_v53 }
 0x341   :  { %vm1118_vm4 = vweird.f32 %v1076_v53 }
 0x342   :  { %v2454_v25 = vpop.eup %1802  ;;  %v1071_v56 = vmul.f32 1.442695, %v1035_v54  ;;  %vm1123_vm6 = vcmp.eq.f32.partialorder %v1122_v2, 8.507059e+37 }
 0x343   :  { %1107 = vadd.xlane.f32.xlu2 %v2454_v25 }
 0x344   :  { %1806 = vpow2.f32 %v1071_v56 }
 0x345   :  { %v1017_v58 = vpop.xlane.xlu0 %1016 }
 0x346   :  { %v1805_v13 = vpop.eup %1804  ;;  %v1036_v12 = vsub.f32 %v2390_v49, %v1017_v58  ;;  %v1125_v49 = vor.u32 1.1754944e-38, %v1124_v40 }
 0x347   :  { %v1114_v35 = vmul.f32 %v1805_v13, %v1076_v53  ;;  %v1078_v63 = vpop.xlane.xlu2 %1077  ;;  %vm1119_vm3 = vweird.f32 %v1805_v13 }
 0x348   :  { %v1073_v14 = vmul.f32 1.442695, %v1036_v12  ;;  %1808 = vrcp.f32 %v1078_v63  ;;  %vm1120_vm5 = vmor %vm1118_vm4, %vm1119_vm3  ;;  %v1139_v23 = vand.u32 2147483648, %v1078_v63  ;;  %v1137_v57 = vand.u32 2147483647, %v1078_v63 }
 0x349   :  { %v1115_v55 = vsub.f32 1.0, %v1114_v35  ;;  %vm1133_vm8 = vweird.f32 %v1078_v63 }
 0x34a   :  { %v2458_v61 = vpop.eup %1806  ;;  %1810 = vpow2.f32 %v1073_v14  ;;  %v1140_v31 = vor.u32 1.1754944e-38, %v1139_v23  ;;  %vm1138_vm10 = vcmp.eq.f32.partialorder %v1137_v57, 8.507059e+37 }
 0x34b   :  { %v1116_v20 = vmul.f32 %v1805_v13, %v1115_v55  ;;  %1109 = vadd.xlane.f32.xlu0 %v2458_v61 }
 0x34d   :  { %v1117_v7 = vadd.f32 %v1805_v13, %v1116_v20  ;;  %v1080_v8 = vpop.xlane.xlu0 %1079 }
 0x34e   :  { %v1809_v9 = vpop.eup %1808  ;;  %1812 = vrcp.f32 %v1080_v8  ;;  %v1082_v44 = vpop.xlane.xlu1 %1081  ;;  %v1152_v37 = vand.u32 2147483647, %v1080_v8  ;;  %v1154_v39 = vand.u32 2147483648, %v1080_v8  ;;  %vm1148_vm13 = vweird.f32 %v1080_v8 }
 0x34f   :  { %v1121_v10 = vsel %vm1120_vm5, %v1805_v13, %v1117_v7  ;;  %v1129_v11 = vmul.f32 %v1809_v9, %v1078_v63  ;;  %1814 = vrcp.f32 %v1082_v44  ;;  %vm1134_vm7 = vweird.f32 %v1809_v9 }
 0x350   :  { %v2461_v48 = vpop.eup %1810  ;;  %v1126_v17 = vsel %vm1123_vm6, %v1125_v49, %v1121_v10  ;;  %vm1135_vm9 = vmor %vm1133_vm8, %vm1134_vm7  ;;  %v1169_v15 = vand.u32 2147483648, %v1082_v44  ;;  %v1167_v47 = vand.u32 2147483647, %v1082_v44  ;;  %v1155_v51 = vor.u32 1.1754944e-38, %v1154_v39 }
 0x351   :  { %v1127_v18 = vmul.f32 %v2384_v43, %v1126_v17  ;;  %v1130_v52 = vsub.f32 1.0, %v1129_v11  ;;  %1111 = vadd.xlane.f32.xlu1 %v2461_v48  ;;  %vm1163_vm15 = vweird.f32 %v1082_v44  ;;  %vm1153_vm0 = vcmp.eq.f32.partialorder %v1152_v37, 8.507059e+37 }
 0x352   :  { %v1170_v56 = vor.u32 1.1754944e-38, %v1169_v15  ;;  %vm1168_vm2 = vcmp.eq.f32.partialorder %v1167_v47, 8.507059e+37 }
 0x353   :  { %1398 = vst [vmem:[#allocation7] sm:$0xff] %v1127_v18  ;;  %v1131_v22 = vmul.f32 %v1809_v9, %v1130_v52 }
 0x354   :  { %v1813_v26 = vpop.eup %1812 }
 0x355   :  { %v1815_v27 = vpop.eup %1814  ;;  %v1132_v62 = vadd.f32 %v1809_v9, %v1131_v22  ;;  %v1144_v30 = vmul.f32 %v1813_v26, %v1080_v8  ;;  %vm1149_vm11 = vweird.f32 %v1813_v26 }
 0x356   :  { %v1159_v1 = vmul.f32 %v1815_v27, %v1082_v44  ;;  %v1084_v33 = vpop.xlane.xlu2 %1083  ;;  %vm1164_vm12 = vweird.f32 %v1815_v27  ;;  %vm1150_vm14 = vmor %vm1148_vm13, %vm1149_vm11 }
 0x357   :  { %v1136_v34 = vsel %vm1135_vm9, %v1809_v9, %v1132_v62  ;;  %v1145_v43 = vsub.f32 1.0, %v1144_v30  ;;  %1816 = vrcp.f32 %v1084_v33  ;;  %vm1165_vm1 = vmor %vm1163_vm15, %vm1164_vm12  ;;  %v1184_v20 = vand.u32 2147483648, %v1084_v33 }
 0x358   :  { %v1141_v6 = vsel %vm1138_vm10, %v1140_v31, %v1136_v34  ;;  %v1160_v4 = vsub.f32 1.0, %v1159_v1  ;;  %v1182_v7 = vand.u32 2147483647, %v1084_v33  ;;  %vm1178_vm4 = vweird.f32 %v1084_v33 }
 0x359   :  { %v1142_v42 = vmul.f32 %v2395_v38, %v1141_v6  ;;  %v1146_v45 = vmul.f32 %v1813_v26, %v1145_v43  ;;  %v1185_v49 = vor.u32 1.1754944e-38, %v1184_v20 }
 0x35a   :  { %v1161_v46 = vmul.f32 %v1815_v27, %v1160_v4  ;;  %vm1183_vm6 = vcmp.eq.f32.partialorder %v1182_v7, 8.507059e+37 }
 0x35b   :  { %1399 = vst [vmem:[#allocation7 + $0x8] sm:$0xff] %v1142_v42  ;;  %v1147_v19 = vadd.f32 %v1813_v26, %v1146_v45 }
 0x35c   :  { %v1162_v53 = vadd.f32 %v1815_v27, %v1161_v46 }
 0x35d   :  { %v1817_v38 = vpop.eup %1816  ;;  %v1151_v54 = vsel %vm1150_vm14, %v1813_v26, %v1147_v19 }
 0x35e   :  { %v1156_v58 = vsel %vm1153_vm0, %v1155_v51, %v1151_v54  ;;  %v1166_v13 = vsel %vm1165_vm1, %v1815_v27, %v1162_v53  ;;  %v1174_v12 = vmul.f32 %v1817_v38, %v1084_v33  ;;  %v1086_v35 = vpop.xlane.xlu0 %1085  ;;  %vm1179_vm3 = vweird.f32 %v1817_v38 }
 0x35f   :  { %v1157_v63 = vmul.f32 %v2399_v59, %v1156_v58  ;;  %v1171_v14 = vsel %vm1168_vm2, %v1170_v56, %v1166_v13  ;;  %1818 = vrcp.f32 %v1086_v35  ;;  %vm1180_vm5 = vmor %vm1178_vm4, %vm1179_vm3  ;;  %v1199_v18 = vand.u32 2147483648, %v1086_v35 }
 0x360   :  { %v1172_v55 = vmul.f32 %v2401_v60, %v1171_v14  ;;  %v1175_v40 = vsub.f32 1.0, %v1174_v12  ;;  %v1197_v23 = vand.u32 2147483647, %v1086_v35  ;;  %vm1193_vm8 = vweird.f32 %v1086_v35 }
 0x361   :  { %1400 = vst [vmem:[#allocation7 + $0x10] sm:$0xff] %v1157_v63  ;;  %v1200_v26 = vor.u32 1.1754944e-38, %v1199_v18 }
 0x362   :  { %1401 = vst [vmem:[#allocation7 + $0x18] sm:$0xff] %v1172_v55  ;;  %v1176_v2 = vmul.f32 %v1817_v38, %v1175_v40  ;;  %vm1198_vm10 = vcmp.eq.f32.partialorder %v1197_v23, 8.507059e+37 }
 0x364   :  { %v1177_v8 = vadd.f32 %v1817_v38, %v1176_v2 }
 0x365   :  { %v1819_v9 = vpop.eup %1818 }
 0x366   :  { %v1181_v44 = vsel %vm1180_vm5, %v1817_v38, %v1177_v8  ;;  %v1189_v10 = vmul.f32 %v1819_v9, %v1086_v35  ;;  %v1088_v59 = vpop.xlane.xlu1 %1087  ;;  %vm1194_vm7 = vweird.f32 %v1819_v9 }
 0x367   :  { %v1186_v11 = vsel %vm1183_vm6, %v1185_v49, %v1181_v44  ;;  %1820 = vrcp.f32 %v1088_v59  ;;  %vm1195_vm9 = vmor %vm1193_vm8, %vm1194_vm7  ;;  %v1214_v33 = vand.u32 2147483648, %v1088_v59  ;;  %v1212_v43 = vand.u32 2147483647, %v1088_v59 }
 0x368   :  { %v1187_v60 = vmul.f32 %v2406_v0, %v1186_v11  ;;  %v1190_v17 = vsub.f32 1.0, %v1189_v10  ;;  %vm1208_vm12 = vweird.f32 %v1088_v59 }
 0x369   :  { %v1215_v39 = vor.u32 1.1754944e-38, %v1214_v33  ;;  %vm1213_vm14 = vcmp.eq.f32.partialorder %v1212_v43, 8.507059e+37 }
 0x36a   :  { %1402 = vst [vmem:[#allocation7 + $0x20] sm:$0xff] %v1187_v60  ;;  %v1191_v52 = vmul.f32 %v1819_v9, %v1190_v17 }
 0x36c   :  { %v1192_v22 = vadd.f32 %v1819_v9, %v1191_v52 }
 0x36d   :  { %v1821_v57 = vpop.eup %1820 }
 0x36e   :  { %v1196_v27 = vsel %vm1195_vm9, %v1819_v9, %v1192_v22  ;;  %v1204_v62 = vmul.f32 %v1821_v57, %v1088_v59  ;;  %v1090_v30 = vpop.xlane.xlu2 %1089  ;;  %vm1209_vm11 = vweird.f32 %v1821_v57 }
 0x36f   :  { %v1201_v31 = vsel %vm1198_vm10, %v1200_v26, %v1196_v27  ;;  %1822 = vrcp.f32 %v1090_v30  ;;  %vm1210_vm13 = vmor %vm1208_vm12, %vm1209_vm11  ;;  %v1229_v47 = vand.u32 2147483648, %v1090_v30  ;;  %v1227_v51 = vand.u32 2147483647, %v1090_v30 }
 0x370   :  { %v1202_v1 = vmul.f32 %v2410_v3, %v1201_v31  ;;  %v1205_v0 = vsub.f32 1.0, %v1204_v62  ;;  %vm1223_vm0 = vweird.f32 %v1090_v30 }
 0x371   :  { %v1230_v54 = vor.u32 1.1754944e-38, %v1229_v47  ;;  %vm1228_vm2 = vcmp.eq.f32.partialorder %v1227_v51, 8.507059e+37 }
 0x372   :  { %1403 = vst [vmem:[#allocation7 + $0x28] sm:$0xff] %v1202_v1  ;;  %v1206_v34 = vmul.f32 %v1821_v57, %v1205_v0 }
 0x374   :  { %v1207_v6 = vadd.f32 %v1821_v57, %v1206_v34 }
 0x375   :  { %v1823_v37 = vpop.eup %1822 }
 0x376   :  { %v1211_v4 = vsel %vm1210_vm13, %v1821_v57, %v1207_v6  ;;  %v1219_v42 = vmul.f32 %v1823_v37, %v1090_v30  ;;  %v1092_v45 = vpop.xlane.xlu0 %1091  ;;  %vm1224_vm15 = vweird.f32 %v1823_v37 }
 0x377   :  { %v1216_v15 = vsel %vm1213_vm14, %v1215_v39, %v1211_v4  ;;  %1824 = vrcp.f32 %v1092_v45  ;;  %vm1225_vm1 = vmor %vm1223_vm0, %vm1224_vm15  ;;  %v1244_v63 = vand.u32 2147483648, %v1092_v45  ;;  %v1242_v55 = vand.u32 2147483647, %v1092_v45 }
 0x378   :  { %v1217_v46 = vmul.f32 %v2414_v5, %v1216_v15  ;;  %v1220_v3 = vsub.f32 1.0, %v1219_v42  ;;  %vm1238_vm4 = vweird.f32 %v1092_v45 }
 0x379   :  { %v1245_v2 = vor.u32 1.1754944e-38, %v1244_v63  ;;  %vm1243_vm6 = vcmp.eq.f32.partialorder %v1242_v55, 8.507059e+37 }
 0x37a   :  { %1404 = vst [vmem:[#allocation7 + $0x30] sm:$0xff] %v1217_v46  ;;  %v1221_v19 = vmul.f32 %v1823_v37, %v1220_v3 }
 0x37c   :  { %v1222_v53 = vadd.f32 %v1823_v37, %v1221_v19 }
 0x37d   :  { %v1825_v38 = vpop.eup %1824 }
 0x37e   :  { %v1226_v56 = vsel %vm1225_vm1, %v1823_v37, %v1222_v53  ;;  %v1234_v58 = vmul.f32 %v1825_v38, %v1092_v45  ;;  %v1094_v13 = vpop.xlane.xlu1 %1093  ;;  %vm1239_vm3 = vweird.f32 %v1825_v38 }
 0x37f   :  { %v1231_v12 = vsel %vm1228_vm2, %v1230_v54, %v1226_v56  ;;  %1826 = vrcp.f32 %v1094_v13  ;;  %vm1240_vm5 = vmor %vm1238_vm4, %vm1239_vm3  ;;  %v1259_v10 = vand.u32 2147483648, %v1094_v13  ;;  %v1257_v11 = vand.u32 2147483647, %v1094_v13 }
 0x380   :  { %v1232_v35 = vmul.f32 %v2418_v16, %v1231_v12  ;;  %v1235_v5 = vsub.f32 1.0, %v1234_v58  ;;  %vm1253_vm8 = vweird.f32 %v1094_v13 }
 0x381   :  { %v1260_v18 = vor.u32 1.1754944e-38, %v1259_v10  ;;  %vm1258_vm10 = vcmp.eq.f32.partialorder %v1257_v11, 8.507059e+37 }
 0x382   :  { %1405 = vst [vmem:[#allocation7 + $0x38] sm:$0xff] %v1232_v35  ;;  %v1236_v14 = vmul.f32 %v1825_v38, %v1235_v5 }
 0x384   :  { %v1237_v40 = vadd.f32 %v1825_v38, %v1236_v14 }
 0x385   :  { %v1827_v20 = vpop.eup %1826 }
 0x386   :  { %v1241_v7 = vsel %vm1240_vm5, %v1825_v38, %v1237_v40  ;;  %v1249_v8 = vmul.f32 %v1827_v20, %v1094_v13  ;;  %v1096_v9 = vpop.xlane.xlu2 %1095  ;;  %vm1254_vm7 = vweird.f32 %v1827_v20 }
 0x387   :  { %v1246_v49 = vsel %vm1243_vm6, %v1245_v2, %v1241_v7  ;;  %1828 = vrcp.f32 %v1096_v9  ;;  %vm1255_vm9 = vmor %vm1253_vm8, %vm1254_vm7  ;;  %v1274_v27 = vand.u32 2147483648, %v1096_v9  ;;  %v1272_v30 = vand.u32 2147483647, %v1096_v9 }
 0x388   :  { %v1247_v44 = vmul.f32 %v2422_v21, %v1246_v49  ;;  %v1250_v16 = vsub.f32 1.0, %v1249_v8  ;;  %vm1268_vm12 = vweird.f32 %v1096_v9 }
 0x389   :  { %v1275_v0 = vor.u32 1.1754944e-38, %v1274_v27  ;;  %vm1273_vm14 = vcmp.eq.f32.partialorder %v1272_v30, 8.507059e+37 }
 0x38a   :  { %1406 = vst [vmem:[#allocation7 + $0x40] sm:$0xff] %v1247_v44  ;;  %v1251_v59 = vmul.f32 %v1827_v20, %v1250_v16 }
 0x38c   :  { %v1252_v60 = vadd.f32 %v1827_v20, %v1251_v59 }
 0x38d   :  { %v1829_v17 = vpop.eup %1828 }
 0x38e   :  { %v1256_v52 = vsel %vm1255_vm9, %v1827_v20, %v1252_v60  ;;  %v1264_v23 = vmul.f32 %v1829_v17, %v1096_v9  ;;  %v1098_v22 = vpop.xlane.xlu0 %1097  ;;  %vm1269_vm11 = vweird.f32 %v1829_v17 }
 0x38f   :  { %v1261_v57 = vsel %vm1258_vm10, %v1260_v18, %v1256_v52  ;;  %1830 = vrcp.f32 %v1098_v22  ;;  %vm1270_vm13 = vmor %vm1268_vm12, %vm1269_vm11  ;;  %v1289_v39 = vand.u32 2147483648, %v1098_v22  ;;  %v1287_v42 = vand.u32 2147483647, %v1098_v22 }
 0x390   :  { %v1262_v26 = vmul.f32 %v2426_v24, %v1261_v57  ;;  %v1265_v21 = vsub.f32 1.0, %v1264_v23  ;;  %vm1283_vm0 = vweird.f32 %v1098_v22 }
 0x391   :  { %v1290_v46 = vor.u32 1.1754944e-38, %v1289_v39  ;;  %vm1288_vm2 = vcmp.eq.f32.partialorder %v1287_v42, 8.507059e+37 }
 0x392   :  { %1407 = vst [vmem:[#allocation7 + $0x48] sm:$0xff] %v1262_v26  ;;  %v1266_v62 = vmul.f32 %v1829_v17, %v1265_v21 }
 0x394   :  { %v1267_v31 = vadd.f32 %v1829_v17, %v1266_v62 }
 0x395   :  { %v1831_v1 = vpop.eup %1830 }
 0x396   :  { %v1271_v33 = vsel %vm1270_vm13, %v1829_v17, %v1267_v31  ;;  %v1279_v34 = vmul.f32 %v1831_v1, %v1098_v22  ;;  %v1100_v43 = vpop.xlane.xlu1 %1099  ;;  %vm1284_vm15 = vweird.f32 %v1831_v1 }
 0x397   :  { %v1276_v6 = vsel %vm1273_vm14, %v1275_v0, %v1271_v33  ;;  %1832 = vrcp.f32 %v1100_v43  ;;  %vm1285_vm1 = vmor %vm1283_vm0, %vm1284_vm15  ;;  %v1304_v38 = vand.u32 2147483648, %v1100_v43  ;;  %v1302_v56 = vand.u32 2147483647, %v1100_v43 }
 0x398   :  { %v1277_v37 = vmul.f32 %v2430_v29, %v1276_v6  ;;  %v1280_v24 = vsub.f32 1.0, %v1279_v34  ;;  %vm1298_vm4 = vweird.f32 %v1100_v43 }
 0x399   :  { %v1305_v12 = vor.u32 1.1754944e-38, %v1304_v38  ;;  %vm1303_vm6 = vcmp.eq.f32.partialorder %v1302_v56, 8.507059e+37 }
 0x39a   :  { %1408 = vst [vmem:[#allocation7 + $0x50] sm:$0xff] %v1277_v37  ;;  %v1281_v4 = vmul.f32 %v1831_v1, %v1280_v24 }
 0x39c   :  { %v1282_v45 = vadd.f32 %v1831_v1, %v1281_v4 }
 0x39d   :  { %v1833_v15 = vpop.eup %1832 }
 0x39e   :  { %v1286_v3 = vsel %vm1285_vm1, %v1831_v1, %v1282_v45  ;;  %v1294_v47 = vmul.f32 %v1833_v15, %v1100_v43  ;;  %v1102_v19 = vpop.xlane.xlu2 %1101  ;;  %vm1299_vm3 = vweird.f32 %v1833_v15 }
 0x39f   :  { %v1291_v51 = vsel %vm1288_vm2, %v1290_v46, %v1286_v3  ;;  %1834 = vrcp.f32 %v1102_v19  ;;  %vm1300_vm5 = vmor %vm1298_vm4, %vm1299_vm3  ;;  %v1319_v40 = vand.u32 2147483648, %v1102_v19  ;;  %v1317_v2 = vand.u32 2147483647, %v1102_v19 }
 0x3a0   :  { %v1292_v53 = vmul.f32 %v2434_v32, %v1291_v51  ;;  %v1295_v29 = vsub.f32 1.0, %v1294_v47  ;;  %vm1313_vm8 = vweird.f32 %v1102_v19 }
 0x3a1   :  { %v1320_v9 = vor.u32 1.1754944e-38, %v1319_v40  ;;  %vm1318_vm10 = vcmp.eq.f32.partialorder %v1317_v2, 8.507059e+37 }
 0x3a2   :  { %1409 = vst [vmem:[#allocation7 + $0x58] sm:$0xff] %v1292_v53  ;;  %v1296_v54 = vmul.f32 %v1833_v15, %v1295_v29 }
 0x3a4   :  { %v1297_v58 = vadd.f32 %v1833_v15, %v1296_v54 }
 0x3a5   :  { %v1835_v13 = vpop.eup %1834 }
 0x3a6   :  { %v1301_v35 = vsel %vm1300_vm5, %v1833_v15, %v1297_v58  ;;  %v1309_v5 = vmul.f32 %v1835_v13, %v1102_v19  ;;  %v1104_v63 = vpop.xlane.xlu0 %1103  ;;  %vm1314_vm7 = vweird.f32 %v1835_v13 }
 0x3a7   :  { %v1306_v14 = vsel %vm1303_vm6, %v1305_v12, %v1301_v35  ;;  %1836 = vrcp.f32 %v1104_v63  ;;  %vm1315_vm9 = vmor %vm1313_vm8, %vm1314_vm7  ;;  %v1334_v11 = vand.u32 2147483648, %v1104_v63  ;;  %v1332_v17 = vand.u32 2147483647, %v1104_v63 }
 0x3a8   :  { %v1307_v55 = vmul.f32 %v2438_v36, %v1306_v14  ;;  %v1310_v32 = vsub.f32 1.0, %v1309_v5  ;;  %vm1328_vm12 = vweird.f32 %v1104_v63 }
 0x3a9   :  { %v1335_v23 = vor.u32 1.1754944e-38, %v1334_v11  ;;  %vm1333_vm14 = vcmp.eq.f32.partialorder %v1332_v17, 8.507059e+37 }
 0x3aa   :  { %1410 = vst [vmem:[#allocation7 + $0x60] sm:$0xff] %v1307_v55  ;;  %v1311_v20 = vmul.f32 %v1835_v13, %v1310_v32 }
 0x3ac   :  { %v1312_v7 = vadd.f32 %v1835_v13, %v1311_v20 }
 0x3ad   :  { %v1837_v8 = vpop.eup %1836 }
 0x3ae   :  { %v1316_v49 = vsel %vm1315_vm9, %v1835_v13, %v1312_v7  ;;  %v1324_v44 = vmul.f32 %v1837_v8, %v1104_v63  ;;  %v1106_v16 = vpop.xlane.xlu1 %1105  ;;  %vm1329_vm11 = vweird.f32 %v1837_v8 }
 0x3af   :  { %v1321_v10 = vsel %vm1318_vm10, %v1320_v9, %v1316_v49  ;;  %1838 = vrcp.f32 %v1106_v16  ;;  %vm1330_vm13 = vmor %vm1328_vm12, %vm1329_vm11  ;;  %v1349_v62 = vand.u32 2147483648, %v1106_v16  ;;  %v1347_v31 = vand.u32 2147483647, %v1106_v16 }
 0x3b0   :  { %v1322_v59 = vmul.f32 %v2442_v41, %v1321_v10  ;;  %v1325_v36 = vsub.f32 1.0, %v1324_v44  ;;  %vm1343_vm0 = vweird.f32 %v1106_v16 }
 0x3b1   :  { %v1350_v33 = vor.u32 1.1754944e-38, %v1349_v62  ;;  %vm1348_vm2 = vcmp.eq.f32.partialorder %v1347_v31, 8.507059e+37 }
 0x3b2   :  { %1411 = vst [vmem:[#allocation7 + $0x68] sm:$0xff] %v1322_v59  ;;  %v1326_v60 = vmul.f32 %v1837_v8, %v1325_v36 }
 0x3b4   :  { %v1327_v18 = vadd.f32 %v1837_v8, %v1326_v60 }
 0x3b5   :  { %v1839_v52 = vpop.eup %1838 }
 0x3b6   :  { %v1331_v22 = vsel %vm1330_vm13, %v1837_v8, %v1327_v18  ;;  %v1339_v57 = vmul.f32 %v1839_v52, %v1106_v16  ;;  %v1108_v26 = vpop.xlane.xlu2 %1107  ;;  %vm1344_vm15 = vweird.f32 %v1839_v52 }
 0x3b7   :  { %v1336_v21 = vsel %vm1333_vm14, %v1335_v23, %v1331_v22  ;;  %1840 = vrcp.f32 %v1108_v26  ;;  %vm1345_vm1 = vmor %vm1343_vm0, %vm1344_vm15  ;;  %v1364_v39 = vand.u32 2147483648, %v1108_v26  ;;  %v1362_v42 = vand.u32 2147483647, %v1108_v26 }
 0x3b8   :  { %v1337_v27 = vmul.f32 %v2446_v28, %v1336_v21  ;;  %v1340_v41 = vsub.f32 1.0, %v1339_v57  ;;  %vm1358_vm4 = vweird.f32 %v1108_v26 }
 0x3b9   :  { %v1365_v3 = vor.u32 1.1754944e-38, %v1364_v39  ;;  %vm1363_vm6 = vcmp.eq.f32.partialorder %v1362_v42, 8.507059e+37 }
 0x3ba   :  { %1412 = vst [vmem:[#allocation7 + $0x70] sm:$0xff] %v1337_v27  ;;  %v1341_v30 = vmul.f32 %v1839_v52, %v1340_v41 }
 0x3bc   :  { %v1342_v1 = vadd.f32 %v1839_v52, %v1341_v30 }
 0x3bd   :  { %v1841_v0 = vpop.eup %1840 }
 0x3be   :  { %v1346_v34 = vsel %vm1345_vm1, %v1839_v52, %v1342_v1  ;;  %v1354_v43 = vmul.f32 %v1841_v0, %v1108_v26  ;;  %v1110_v6 = vpop.xlane.xlu0 %1109  ;;  %vm1359_vm3 = vweird.f32 %v1841_v0 }
 0x3bf   :  { %v1351_v37 = vsel %vm1348_vm2, %v1350_v33, %v1346_v34  ;;  %1842 = vrcp.f32 %v1110_v6  ;;  %vm1360_vm5 = vmor %vm1358_vm4, %vm1359_vm3  ;;  %v1379_v29 = vand.u32 2147483648, %v1110_v6  ;;  %v1377_v54 = vand.u32 2147483647, %v1110_v6 }
 0x3c0   :  { %v1352_v24 = vmul.f32 %v2450_v50, %v1351_v37  ;;  %v1355_v28 = vsub.f32 1.0, %v1354_v43  ;;  %vm1373_vm8 = vweird.f32 %v1110_v6 }
 0x3c1   :  { %v1380_v12 = vor.u32 1.1754944e-38, %v1379_v29  ;;  %vm1378_vm10 = vcmp.eq.f32.partialorder %v1377_v54, 8.507059e+37 }
 0x3c2   :  { %1413 = vst [vmem:[#allocation7 + $0x78] sm:$0xff] %v1352_v24  ;;  %v1356_v4 = vmul.f32 %v1841_v0, %v1355_v28 }
 0x3c4   :  { %v1357_v45 = vadd.f32 %v1841_v0, %v1356_v4  ;;  %v1112_v15 = vpop.xlane.xlu1 %1111 }
 0x3c5   :  { %v1843_v46 = vpop.eup %1842  ;;  %1844 = vrcp.f32 %v1112_v15  ;;  %v1394_v14 = vand.u32 2147483648, %v1112_v15  ;;  %v1392_v32 = vand.u32 2147483647, %v1112_v15  ;;  %vm1388_vm12 = vweird.f32 %v1112_v15 }
 0x3c6   :  { %v1361_v47 = vsel %vm1360_vm5, %v1841_v0, %v1357_v45  ;;  %v1369_v19 = vmul.f32 %v1843_v46, %v1110_v6  ;;  %vm1374_vm7 = vweird.f32 %v1843_v46 }
 0x3c7   :  { %v1366_v51 = vsel %vm1363_vm6, %v1365_v3, %v1361_v47  ;;  %vm1375_vm9 = vmor %vm1373_vm8, %vm1374_vm7  ;;  %v1395_v20 = vor.u32 1.1754944e-38, %v1394_v14  ;;  %vm1393_vm14 = vcmp.eq.f32.partialorder %v1392_v32, 8.507059e+37 }
 0x3c8   :  { %v1367_v53 = vmul.f32 %v2454_v25, %v1366_v51  ;;  %v1370_v50 = vsub.f32 1.0, %v1369_v19 }
 0x3ca   :  { %1414 = vst [vmem:[#allocation7 + $0x80] sm:$0xff] %v1367_v53  ;;  %v1371_v38 = vmul.f32 %v1843_v46, %v1370_v50 }
 0x3cb   :  { %v1845_v56 = vpop.eup %1844 }
 0x3cc   :  { %v1372_v58 = vadd.f32 %v1843_v46, %v1371_v38  ;;  %v1384_v13 = vmul.f32 %v1845_v56, %v1112_v15  ;;  %vm1389_vm11 = vweird.f32 %v1845_v56 }
 0x3cd   :  { %vm1390_vm13 = vmor %vm1388_vm12, %vm1389_vm11 }
 0x3ce   :  { %v1376_v35 = vsel %vm1375_vm9, %v1843_v46, %v1372_v58  ;;  %v1385_v5 = vsub.f32 1.0, %v1384_v13 }
 0x3cf   :  { %v1381_v63 = vsel %vm1378_vm10, %v1380_v12, %v1376_v35 }
 0x3d0   :  { %v1382_v55 = vmul.f32 %v2458_v61, %v1381_v63  ;;  %v1386_v25 = vmul.f32 %v1845_v56, %v1385_v5 }
 0x3d2   :  { %1415 = vst [vmem:[#allocation7 + $0x88] sm:$0xff] %v1382_v55  ;;  %v1387_v40 = vadd.f32 %v1845_v56, %v1386_v25 }
 0x3d4   :  { %v1391_v2 = vsel %vm1390_vm13, %v1845_v56, %v1387_v40 }
 0x3d5   :  { %v1396_v7 = vsel %vm1393_vm14, %v1395_v20, %v1391_v2 }
 0x3d6   :  { %v1397_v8 = vmul.f32 %v2461_v48, %v1396_v7 }
 0x3d8   :  { %1416 = vst [vmem:[#allocation7 + $0x90] sm:$0xff] %v1397_v8 }
 0x3d9   :  { %1448 = dma.vmem_to_hbm [thread:$0]  %s1441_s13, 2432, %s1443_s5, [#allocation4], %s1955_s29, %s1955_s29, %s1956_s30  }
 0x3da   :  { %1946 = dma.done.wait [#allocation4], 2432  }
 0x3db   :  { %1947 = vsyncadd [#allocation4], 4294964864 }
 0x3dc   :  { %1948 = dma.done.wait [#allocation9], 2432  }
 0x3dd   :  { %1949 = vsyncadd [#allocation9], 4294964864 }
 0x3de   :  { %1470 = vsyncpa [#allocation3], 1 }
 0x3df   :  { %1471 = vsyncpa [#allocation6], 1 }
 0x3e0   :  { %1472 = vsyncpa [#allocation4], 1 }
 0x3e1   :  { %1473 = vsyncpa [#allocation9], 1 }

</bundles_post_ra>
